<compile_context>
chip_gen: v5e
topology: v5e:2x2
jax: 0.10.0
libtpu: 0.0.40
codegen_flags: <defaults>
</compile_context>

<pallas_src>
import functools

import jax
import jax.numpy as jnp
from jax.experimental import pallas as pl
from jax.experimental.pallas import tpu as pltpu


_COMPILER_PARAMS = pltpu.CompilerParams(
    dimension_semantics=("parallel", "arbitrary"),
    vmem_limit_bytes=16 * 1024 * 1024,
)


# ---------------------------------------------------------------------------
# in-kernel helpers
# ---------------------------------------------------------------------------
def _layer_norm(x, gamma, beta, eps=1e-6):
    mu = jnp.mean(x, axis=-1, keepdims=True)
    var = jnp.mean(jnp.square(x - mu), axis=-1, keepdims=True)
    return (x - mu) * jax.lax.rsqrt(var + eps) * gamma + beta  # rsqrt -> EUP


def _attend(q, k, v, keep_mask, *, n_head, d_k, d_v):
    """Batched-head scaled-dot-product attention.

    q: (Lq, H*dk) f32 (scale already folded into Wq), k: (Lk, H*dk), v: (Lk, H*dv).
    keep_mask: bool, broadcastable to (Lq, Lk).  Returns (Lq, H*dv) f32.
    """
    Lq = q.shape[0]
    Lk = k.shape[0]

    qh = q.reshape(Lq, n_head, d_k).transpose(1, 0, 2).astype(jnp.bfloat16)  # (H,Lq,dk)
    kh = k.reshape(Lk, n_head, d_k).transpose(1, 0, 2).astype(jnp.bfloat16)  # (H,Lk,dk)
    vh = v.reshape(Lk, n_head, d_v).transpose(1, 0, 2).astype(jnp.bfloat16)  # (H,Lk,dv)

    s = jnp.einsum("hqd,hkd->hqk", qh, kh, preferred_element_type=jnp.float32)
    s = jnp.where(keep_mask, s, -1.0e9)          # Python float literal (no captured const)
    s = s - jnp.max(s, axis=-1, keepdims=True)
    e = jnp.exp(s)
    attn = e * pl.reciprocal(jnp.sum(e, axis=-1, keepdims=True), approx=True)

    ctx = jnp.einsum("hqk,hkd->hqd", attn.astype(jnp.bfloat16), vh,
                     preferred_element_type=jnp.float32)      # (H, Lq, dv)
    return ctx.transpose(1, 0, 2).reshape(Lq, n_head * d_v)


def _self_attn(x, keep_mask, w_qkv, w_o, gamma, beta, *, n_head, d_k, d_v):
    """Fused-QKV multi-head self-attention + residual + LayerNorm."""
    residual = x
    qkv = jnp.dot(x.astype(jnp.bfloat16), w_qkv,
                  preferred_element_type=jnp.float32)          # (L, 3*H*dk)
    hdk = n_head * d_k
    q = qkv[:, :hdk]
    k = qkv[:, hdk:2 * hdk]
    v = qkv[:, 2 * hdk:]
    ctx = _attend(q, k, v, keep_mask, n_head=n_head, d_k=d_k, d_v=d_v)
    o = jnp.dot(ctx.astype(jnp.bfloat16), w_o, preferred_element_type=jnp.float32)
    return _layer_norm(o + residual, gamma, beta)


def _cross_attn(x, enc, keep_mask, w_q, w_kv, w_o, gamma, beta, *, n_head, d_k, d_v):
    """Cross attention (queries from x, keys/values from encoder output)."""
    residual = x
    q = jnp.dot(x.astype(jnp.bfloat16), w_q, preferred_element_type=jnp.float32)
    kv = jnp.dot(enc.astype(jnp.bfloat16), w_kv, preferred_element_type=jnp.float32)
    hdk = n_head * d_k
    k = kv[:, :hdk]
    v = kv[:, hdk:]
    ctx = _attend(q, k, v, keep_mask, n_head=n_head, d_k=d_k, d_v=d_v)
    o = jnp.dot(ctx.astype(jnp.bfloat16), w_o, preferred_element_type=jnp.float32)
    return _layer_norm(o + residual, gamma, beta)


def _ffn(x, fw1, fb1, fw2, fb2, gamma, beta):
    residual = x
    h = jnp.dot(x.astype(jnp.bfloat16), fw1, preferred_element_type=jnp.float32) + fb1
    h = jnp.maximum(h, 0.0)
    y = jnp.dot(h.astype(jnp.bfloat16), fw2, preferred_element_type=jnp.float32) + fb2
    return _layer_norm(y + residual, gamma, beta)


# ---------------------------------------------------------------------------
# fused stack kernels  (grid = (batch, layer))
# ---------------------------------------------------------------------------
def _encoder_stack_kernel(emb_ref, srcmask_ref, pos_ref, pg_ref, pb_ref,
                          wqkv_ref, wo_ref, g1_ref, b1_ref,
                          fw1_ref, fb1_ref, fw2_ref, fb2_ref, g2_ref, b2_ref,
                          out_ref, *, n_head, d_k, d_v, emb_scale):
    l = pl.program_id(1)

    # layer 0: fused prelude (embedding scale + positional encoding + LayerNorm)
    @pl.when(l == 0)
    def _():
        x0 = emb_ref[0] * emb_scale + pos_ref[...]
        out_ref[0] = _layer_norm(x0, pg_ref[...], pb_ref[...])

    x = out_ref[0]                               # activation VMEM-resident across layers
    keep = srcmask_ref[0] != 0                   # (1, Ls) key-pad mask

    x = _self_attn(x, keep, wqkv_ref[0], wo_ref[0], g1_ref[0], b1_ref[0],
                   n_head=n_head, d_k=d_k, d_v=d_v)
    x = _ffn(x, fw1_ref[0], fb1_ref[0], fw2_ref[0], fb2_ref[0], g2_ref[0], b2_ref[0])
    out_ref[0] = x


def _decoder_stack_kernel(emb_ref, enc_ref, trgmask_ref, srcmask_ref,
                          pos_ref, pg_ref, pb_ref,
                          wqkv1_ref, wo1_ref, g1_ref, b1_ref,
                          wq2_ref, wkv2_ref, wo2_ref, g2_ref, b2_ref,
                          fw1_ref, fb1_ref, fw2_ref, fb2_ref, g3_ref, b3_ref,
                          projw_ref,
                          logits_ref, x_scr, *, n_head, d_k, d_v, emb_scale):
    l = pl.program_id(1)
    n_l = pl.num_programs(1)

    @pl.when(l == 0)
    def _():
        x0 = emb_ref[0] * emb_scale + pos_ref[...]
        x_scr[...] = _layer_norm(x0, pg_ref[...], pb_ref[...])

    x = x_scr[...]                               # (Lt, D), VMEM-resident across layers
    enc = enc_ref[0]                             # (Ls, D), DMA'd once per batch element
    Lt = x.shape[0]

    # causal (subsequent) mask built in-kernel -- no O(B*Lt^2) HBM DMA
    row = jax.lax.broadcasted_iota(jnp.int32, (Lt, Lt), 0)
    col = jax.lax.broadcasted_iota(jnp.int32, (Lt, Lt), 1)
    self_keep = jnp.logical_and(row >= col, trgmask_ref[0] != 0)   # (Lt, Lt)
    cross_keep = srcmask_ref[0] != 0                               # (1, Ls)

    x = _self_attn(x, self_keep, wqkv1_ref[0], wo1_ref[0], g1_ref[0], b1_ref[0],
                   n_head=n_head, d_k=d_k, d_v=d_v)
    x = _cross_attn(x, enc, cross_keep, wq2_ref[0], wkv2_ref[0], wo2_ref[0],
                    g2_ref[0], b2_ref[0], n_head=n_head, d_k=d_k, d_v=d_v)
    x = _ffn(x, fw1_ref[0], fb1_ref[0], fw2_ref[0], fb2_ref[0], g3_ref[0], b3_ref[0])
    x_scr[...] = x

    # fused final vocabulary projection (weight shared with the embedding table)
    @pl.when(l == n_l - 1)
    def _():
        logits_ref[0] = jnp.dot(x.astype(jnp.bfloat16), projw_ref[...],
                                preferred_element_type=jnp.float32)


# ---------------------------------------------------------------------------
# pallas_call wrappers
# ---------------------------------------------------------------------------
_ENC_STACK_NAMES = ["w_qkv", "w_o", "g1", "b1",
                    "fw1", "fb1", "fw2", "fb2", "g2", "b2"]

_DEC_STACK_NAMES = ["w_qkv1", "w_o1", "g1", "b1",
                    "w_q2", "w_kv2", "w_o2", "g2", "b2",
                    "fw1", "fb1", "fw2", "fb2", "g3", "b3"]


def _layer_spec(arr):
    # stacked per-layer weight: (n_layer, a, b) -> block (1, a, b) selected by layer index
    return pl.BlockSpec((1,) + arr.shape[1:], lambda b, l: (l, 0, 0))


def _const2d_spec(arr):
    # grid-invariant 2-D tensor (pos table, prelude gamma/beta, projection weight)
    return pl.BlockSpec(arr.shape, lambda b, l: (0, 0))


def _encoder_stack(src_emb, src_key_mask, params, *, n_head, d_k, d_v, emb_scale):
    B, Ls, D = src_emb.shape
    st = params["enc_stack"]
    n_layer = st["w_qkv"].shape[0]
    pos = params["pos_table"][:Ls]
    wargs = [st[n] for n in _ENC_STACK_NAMES]

    in_specs = ([
        pl.BlockSpec((1, Ls, D), lambda b, l: (b, 0, 0)),      # gathered embeddings
        pl.BlockSpec((1, 1, Ls), lambda b, l: (b, 0, 0)),      # src key-pad mask
        _const2d_spec(pos),
        _const2d_spec(params["enc_prelude_g"]),
        _const2d_spec(params["enc_prelude_b"]),
    ] + [_layer_spec(w) for w in wargs])

    kernel = functools.partial(_encoder_stack_kernel, n_head=n_head, d_k=d_k,
                               d_v=d_v, emb_scale=emb_scale)
    return pl.pallas_call(
        kernel,
        out_shape=jax.ShapeDtypeStruct((B, Ls, D), jnp.float32),
        grid_spec=pltpu.PrefetchScalarGridSpec(
            num_scalar_prefetch=0, grid=(B, n_layer),
            in_specs=in_specs,
            out_specs=pl.BlockSpec((1, Ls, D), lambda b, l: (b, 0, 0)),
        ),
        compiler_params=_COMPILER_PARAMS,
    )(src_emb, src_key_mask, pos,
      params["enc_prelude_g"], params["enc_prelude_b"], *wargs)


def _decoder_stack(trg_emb, enc_out, trg_key_mask, src_key_mask, params, *,
                   n_head, d_k, d_v, emb_scale):
    B, Lt, D = trg_emb.shape
    _, Ls, _ = enc_out.shape
    st = params["dec_stack"]
    n_layer = st["w_qkv1"].shape[0]
    V = params["proj_w"].shape[1]
    pos = params["pos_table"][:Lt]
    wargs = [st[n] for n in _DEC_STACK_NAMES]

    in_specs = ([
        pl.BlockSpec((1, Lt, D), lambda b, l: (b, 0, 0)),      # gathered trg embeddings
        pl.BlockSpec((1, Ls, D), lambda b, l: (b, 0, 0)),      # encoder output (per b)
        pl.BlockSpec((1, 1, Lt), lambda b, l: (b, 0, 0)),      # trg key-pad mask
        pl.BlockSpec((1, 1, Ls), lambda b, l: (b, 0, 0)),      # src key-pad mask
        _const2d_spec(pos),
        _const2d_spec(params["dec_prelude_g"]),
        _const2d_spec(params["dec_prelude_b"]),
    ] + [_layer_spec(w) for w in wargs]
      + [_const2d_spec(params["proj_w"])])

    kernel = functools.partial(_decoder_stack_kernel, n_head=n_head, d_k=d_k,
                               d_v=d_v, emb_scale=emb_scale)
    return pl.pallas_call(
        kernel,
        out_shape=jax.ShapeDtypeStruct((B, Lt, V), jnp.float32),
        grid_spec=pltpu.PrefetchScalarGridSpec(
            num_scalar_prefetch=0, grid=(B, n_layer),
            in_specs=in_specs,
            out_specs=pl.BlockSpec((1, Lt, V), lambda b, l: (b, 0, 0)),
            scratch_shapes=[pltpu.VMEM((Lt, D), jnp.float32)],
        ),
        compiler_params=_COMPILER_PARAMS,
    )(trg_emb, enc_out, trg_key_mask, src_key_mask, pos,
      params["dec_prelude_g"], params["dec_prelude_b"], *wargs, params["proj_w"])


# ---------------------------------------------------------------------------
# full Transformer forward
# ---------------------------------------------------------------------------
def transformer_forward(src_seq, trg_seq, params, *, pad_idx, d_model,
                        n_head, d_k, d_v, scale_emb=True):
    B, Ls = src_seq.shape
    _, Lt = trg_seq.shape
    emb_scale = float(d_model) ** 0.5 if scale_emb else 1.0

    # Compressed key-pad masks (B, 1, Lk) int32; causal part is built in-kernel.
    src_key_mask = (src_seq != pad_idx).astype(jnp.int32)[:, None, :]
    trg_key_mask = (trg_seq != pad_idx).astype(jnp.int32)[:, None, :]

    # TODO(synk): embedding token gather stays in plain JAX (data-dependent gather has
    # no clean dense-BlockSpec mapping; would need a manual-DMA/scalar-prefetch gather).
    emb = params["embedding"]
    src_emb = jnp.take(emb, src_seq, axis=0)
    trg_emb = jnp.take(emb, trg_seq, axis=0)

    enc_out = _encoder_stack(src_emb, src_key_mask, params,
                             n_head=n_head, d_k=d_k, d_v=d_v, emb_scale=emb_scale)
    logits = _decoder_stack(trg_emb, enc_out, trg_key_mask, src_key_mask, params,
                            n_head=n_head, d_k=d_k, d_v=d_v, emb_scale=emb_scale)
    return logits.reshape(B * Lt, -1)


# ---------------------------------------------------------------------------
# parameter / table construction
# ---------------------------------------------------------------------------
def _xavier(key, shape):
    fan_in, fan_out = shape
    lim = (6.0 / (fan_in + fan_out)) ** 0.5
    return jax.random.uniform(key, shape, jnp.float32, -lim, lim)


def _sinusoid_table(n_position, d_hid):
    pos = jnp.arange(n_position, dtype=jnp.float32)[:, None]
    i = jnp.arange(d_hid, dtype=jnp.float32)[None, :]
    angle = pos / jnp.power(10000.0, 2.0 * jnp.floor(i / 2.0) / d_hid)
    even = (jnp.arange(d_hid) % 2 == 0)[None, :]
    return jnp.where(even, jnp.sin(angle), jnp.cos(angle)).astype(jnp.float32)


def init_transformer_params(key, vocab, d_model, d_ff, n_head, d_k, d_v,
                            n_layer, n_position, pad_idx):
    keys = iter(jax.random.split(key, 1024))

    def nk():
        return next(keys)

    q_scale = float(d_k) ** -0.5  # 1/sqrt(d_k) folded into Wq at init

    def self_attn_block():
        wq = _xavier(nk(), (d_model, n_head * d_k)) * q_scale
        wk = _xavier(nk(), (d_model, n_head * d_k))
        wv = _xavier(nk(), (d_model, n_head * d_v))
        w_qkv = jnp.concatenate([wq, wk, wv], axis=1).astype(jnp.bfloat16)
        w_o = _xavier(nk(), (n_head * d_v, d_model)).astype(jnp.bfloat16)
        return w_qkv, w_o

    def cross_attn_block():
        w_q = (_xavier(nk(), (d_model, n_head * d_k)) * q_scale).astype(jnp.bfloat16)
        wk = _xavier(nk(), (d_model, n_head * d_k))
        wv = _xavier(nk(), (d_model, n_head * d_v))
        w_kv = jnp.concatenate([wk, wv], axis=1).astype(jnp.bfloat16)
        w_o = _xavier(nk(), (n_head * d_v, d_model)).astype(jnp.bfloat16)
        return w_q, w_kv, w_o

    def ffn_block():
        fw1 = _xavier(nk(), (d_model, d_ff)).astype(jnp.bfloat16)
        fw2 = _xavier(nk(), (d_ff, d_model)).astype(jnp.bfloat16)
        return fw1, fw2

    ones_d = lambda: jnp.ones((1, d_model), jnp.float32)
    zeros_d = lambda: jnp.zeros((1, d_model), jnp.float32)
    zeros_ff = lambda: jnp.zeros((1, d_ff), jnp.float32)

    enc_layers = []
    for _ in range(n_layer):
        w_qkv, w_o = self_attn_block()
        fw1, fw2 = ffn_block()
        enc_layers.append(dict(
            w_qkv=w_qkv, w_o=w_o, g1=ones_d(), b1=zeros_d(),
            fw1=fw1, fb1=zeros_ff(), fw2=fw2, fb2=zeros_d(),
            g2=ones_d(), b2=zeros_d()))

    dec_layers = []
    for _ in range(n_layer):
        w_qkv1, w_o1 = self_attn_block()
        w_q2, w_kv2, w_o2 = cross_attn_block()
        fw1, fw2 = ffn_block()
        dec_layers.append(dict(
            w_qkv1=w_qkv1, w_o1=w_o1, g1=ones_d(), b1=zeros_d(),
            w_q2=w_q2, w_kv2=w_kv2, w_o2=w_o2, g2=ones_d(), b2=zeros_d(),
            fw1=fw1, fb1=zeros_ff(), fw2=fw2, fb2=zeros_d(),
            g3=ones_d(), b3=zeros_d()))

    def stack(layers):
        return {k: jnp.stack([lay[k] for lay in layers], axis=0) for k in layers[0]}

    # shared embedding (src emb == trg emb == final linear weight), pad row zeroed
    emb = _xavier(nk(), (vocab, d_model)).at[pad_idx].set(0.0)

    return {
        "embedding": emb,
        "proj_w": emb.T.astype(jnp.bfloat16),        # (d_model, vocab), weight sharing
        "pos_table": _sinusoid_table(n_position, d_model),
        "enc_prelude_g": ones_d(), "enc_prelude_b": zeros_d(),
        "dec_prelude_g": ones_d(), "dec_prelude_b": zeros_d(),
        "enc_stack": stack(enc_layers),
        "dec_stack": stack(dec_layers),
    }


# ---------------------------------------------------------------------------
if __name__ == "__main__":
    # small, lane-friendly demo config
    B, Ls, Lt = 2, 16, 16
    vocab_size, pad_idx = 256, 0
    d_model, d_ff = 128, 256
    n_head, d_k, d_v = 4, 32, 32
    n_layer, n_position = 2, 64

    key = jax.random.PRNGKey(0)
    k_par, k_src, k_trg = jax.random.split(key, 3)

    src_seq = jax.random.randint(k_src, (B, Ls), 1, vocab_size, dtype=jnp.int32)
    trg_seq = jax.random.randint(k_trg, (B, Lt), 1, vocab_size, dtype=jnp.int32)
    # add some padding positions so the pad masks are exercised
    src_seq = src_seq.at[1, -3:].set(pad_idx)
    trg_seq = trg_seq.at[1, -2:].set(pad_idx)

    params = init_transformer_params(k_par, vocab_size, d_model, d_ff,
                                     n_head, d_k, d_v, n_layer, n_position, pad_idx)

    logits = transformer_forward(src_seq, trg_seq, params,
                                 pad_idx=pad_idx, d_model=d_model,
                                 n_head=n_head, d_k=d_k, d_v=d_v,
                                 scale_emb=True)
    jax.block_until_ready(logits)

    assert logits.shape == (B * Lt, vocab_size)
    assert bool(jnp.all(jnp.isfinite(logits)))
    print("KERNEL_OK")
</pallas_src>

<mosaic_0001>
module attributes {stable_mosaic.version = 11 : i64} {
  func.func @_encoder_stack_kernel(%arg0: i32, %arg1: i32, %arg2: memref<1x16x128xf32, #tpu.memory_space<vmem>>, %arg3: memref<1x1x16xi32, #tpu.memory_space<vmem>>, %arg4: memref<16x128xf32, #tpu.memory_space<vmem>>, %arg5: memref<1x128xf32, #tpu.memory_space<vmem>>, %arg6: memref<1x128xf32, #tpu.memory_space<vmem>>, %arg7: memref<1x128x384xbf16, #tpu.memory_space<vmem>>, %arg8: memref<1x128x128xbf16, #tpu.memory_space<vmem>>, %arg9: memref<1x1x128xf32, #tpu.memory_space<vmem>>, %arg10: memref<1x1x128xf32, #tpu.memory_space<vmem>>, %arg11: memref<1x128x256xbf16, #tpu.memory_space<vmem>>, %arg12: memref<1x1x256xf32, #tpu.memory_space<vmem>>, %arg13: memref<1x256x128xbf16, #tpu.memory_space<vmem>>, %arg14: memref<1x1x128xf32, #tpu.memory_space<vmem>>, %arg15: memref<1x1x128xf32, #tpu.memory_space<vmem>>, %arg16: memref<1x1x128xf32, #tpu.memory_space<vmem>>, %arg17: memref<1x16x128xf32, #tpu.memory_space<vmem>>) attributes {dimension_semantics = [#tpu.dimension_semantics<parallel>, #tpu.dimension_semantics<arbitrary>], iteration_bounds = array<i64: 2, 2>, scalar_prefetch = 0 : i64, scratch_operands = 0 : i64, tpu.core_type = #tpu.core_type<tc>, window_params = [{transform_indices = @transform_0, window_bounds = array<i64: 1, 16, 128>}, {transform_indices = @transform_1, window_bounds = array<i64: 1, 1, 16>}, {pipeline_mode = #tpu.pipeline_mode<synchronous>, transform_indices = @transform_2, window_bounds = array<i64: 16, 128>}, {pipeline_mode = #tpu.pipeline_mode<synchronous>, transform_indices = @transform_3, window_bounds = array<i64: 1, 128>}, {pipeline_mode = #tpu.pipeline_mode<synchronous>, transform_indices = @transform_4, window_bounds = array<i64: 1, 128>}, {transform_indices = @transform_5, window_bounds = array<i64: 1, 128, 384>}, {transform_indices = @transform_6, window_bounds = array<i64: 1, 128, 128>}, {transform_indices = @transform_7, window_bounds = array<i64: 1, 1, 128>}, {transform_indices = @transform_8, window_bounds = array<i64: 1, 1, 128>}, {transform_indices = @transform_9, window_bounds = array<i64: 1, 128, 256>}, {transform_indices = @transform_10, window_bounds = array<i64: 1, 1, 256>}, {transform_indices = @transform_11, window_bounds = array<i64: 1, 256, 128>}, {transform_indices = @transform_12, window_bounds = array<i64: 1, 1, 128>}, {transform_indices = @transform_13, window_bounds = array<i64: 1, 1, 128>}, {transform_indices = @transform_14, window_bounds = array<i64: 1, 1, 128>}, {transform_indices = @transform_15, window_bounds = array<i64: 1, 16, 128>}]} {
    %c0_i32 = arith.constant 0 : i32
    %0 = arith.cmpi eq, %arg1, %c0_i32 : i32
    %1 = arith.extui %0 : i1 to i32
    %c0_i32_0 = arith.constant 0 : i32
    %2 = arith.cmpi ne, %1, %c0_i32_0 : i32
    scf.if %2 {
      %c0_59 = arith.constant 0 : index
      %c0_60 = arith.constant 0 : index
      %c0_61 = arith.constant 0 : index
      %123 = vector.load %arg2[%c0_59, %c0_60, %c0_61] : memref<1x16x128xf32, #tpu.memory_space<vmem>>, vector<1x16x128xf32>
      %124 = vector.shape_cast %123 : vector<1x16x128xf32> to vector<16x128xf32>
      %cst_62 = arith.constant 11.3137083 : f32
      %125 = vector.broadcast %cst_62 : f32 to vector<16x128xf32>
      %126 = arith.mulf %124, %125 : vector<16x128xf32>
      %c0_63 = arith.constant 0 : index
      %c0_64 = arith.constant 0 : index
      %127 = vector.load %arg4[%c0_63, %c0_64] : memref<16x128xf32, #tpu.memory_space<vmem>>, vector<16x128xf32>
      %128 = arith.addf %126, %127 : vector<16x128xf32>
      %c0_65 = arith.constant 0 : index
      %c0_66 = arith.constant 0 : index
      %129 = vector.load %arg5[%c0_65, %c0_66] : memref<1x128xf32, #tpu.memory_space<vmem>>, vector<1x128xf32>
      %c0_67 = arith.constant 0 : index
      %c0_68 = arith.constant 0 : index
      %130 = vector.load %arg6[%c0_67, %c0_68] : memref<1x128xf32, #tpu.memory_space<vmem>>, vector<1x128xf32>
      %cst_69 = arith.constant dense<0.000000e+00> : vector<16xf32>
      %131 = vector.multi_reduction <add>, %128, %cst_69 [1] : vector<16x128xf32> to vector<16xf32>
      %132 = vector.shape_cast %131 : vector<16xf32> to vector<16x1xf32>
      %cst_70 = arith.constant 1.280000e+02 : f32
      %133 = vector.broadcast %cst_70 : f32 to vector<16x1xf32>
      %134 = arith.divf %132, %133 : vector<16x1xf32>
      %135 = vector.broadcast %134 : vector<16x1xf32> to vector<16x128xf32>
      %136 = arith.subf %128, %135 : vector<16x128xf32>
      %137 = arith.mulf %136, %136 : vector<16x128xf32>
      %cst_71 = arith.constant dense<0.000000e+00> : vector<16xf32>
      %138 = vector.multi_reduction <add>, %137, %cst_71 [1] : vector<16x128xf32> to vector<16xf32>
      %139 = vector.shape_cast %138 : vector<16xf32> to vector<16x1xf32>
      %cst_72 = arith.constant 1.280000e+02 : f32
      %140 = vector.broadcast %cst_72 : f32 to vector<16x1xf32>
      %141 = arith.divf %139, %140 : vector<16x1xf32>
      %142 = vector.broadcast %134 : vector<16x1xf32> to vector<16x128xf32>
      %143 = arith.subf %128, %142 : vector<16x128xf32>
      %cst_73 = arith.constant 9.99999997E-7 : f32
      %144 = vector.broadcast %cst_73 : f32 to vector<16x1xf32>
      %145 = arith.addf %141, %144 : vector<16x1xf32>
      %146 = math.rsqrt %145 : vector<16x1xf32>
      %147 = vector.broadcast %146 : vector<16x1xf32> to vector<16x128xf32>
      %148 = arith.mulf %143, %147 : vector<16x128xf32>
      %149 = vector.broadcast %129 : vector<1x128xf32> to vector<16x128xf32>
      %150 = arith.mulf %148, %149 : vector<16x128xf32>
      %151 = vector.broadcast %130 : vector<1x128xf32> to vector<16x128xf32>
      %152 = arith.addf %150, %151 : vector<16x128xf32>
      %c0_74 = arith.constant 0 : index
      %c0_75 = arith.constant 0 : index
      %c0_76 = arith.constant 0 : index
      %153 = vector.load %arg17[%c0_74, %c0_75, %c0_76] : memref<1x16x128xf32, #tpu.memory_space<vmem>>, vector<1x16x128xf32>
      %154 = vector.shape_cast %153 : vector<1x16x128xf32> to vector<16x128xf32>
      %155 = vector.shape_cast %152 : vector<16x128xf32> to vector<1x16x128xf32>
      tpu.vector_store %arg17[%c0_74, %c0_75, %c0_76], %155 {strides = array<i32>} : memref<1x16x128xf32, #tpu.memory_space<vmem>>, vector<1x16x128xf32>,
    } else {
    }
    %c0 = arith.constant 0 : index
    %c0_1 = arith.constant 0 : index
    %c0_2 = arith.constant 0 : index
    %3 = vector.load %arg17[%c0, %c0_1, %c0_2] : memref<1x16x128xf32, #tpu.memory_space<vmem>>, vector<1x16x128xf32>
    %4 = vector.shape_cast %3 : vector<1x16x128xf32> to vector<16x128xf32>
    %c0_3 = arith.constant 0 : index
    %c0_4 = arith.constant 0 : index
    %c0_5 = arith.constant 0 : index
    %5 = vector.load %arg3[%c0_3, %c0_4, %c0_5] : memref<1x1x16xi32, #tpu.memory_space<vmem>>, vector<1x1x16xi32>
    %6 = vector.shape_cast %5 : vector<1x1x16xi32> to vector<1x16xi32>
    %c0_i32_6 = arith.constant 0 : i32
    %7 = vector.broadcast %c0_i32_6 : i32 to vector<1x16xi32>
    %8 = arith.cmpi ne, %6, %7 : vector<1x16xi32>
    %c0_7 = arith.constant 0 : index
    %c0_8 = arith.constant 0 : index
    %c0_9 = arith.constant 0 : index
    %9 = vector.load %arg7[%c0_7, %c0_8, %c0_9] : memref<1x128x384xbf16, #tpu.memory_space<vmem>>, vector<1x128x384xbf16>
    %10 = vector.shape_cast %9 : vector<1x128x384xbf16> to vector<128x384xbf16>
    %c0_10 = arith.constant 0 : index
    %c0_11 = arith.constant 0 : index
    %c0_12 = arith.constant 0 : index
    %11 = vector.load %arg8[%c0_10, %c0_11, %c0_12] : memref<1x128x128xbf16, #tpu.memory_space<vmem>>, vector<1x128x128xbf16>
    %12 = vector.shape_cast %11 : vector<1x128x128xbf16> to vector<128x128xbf16>
    %c0_13 = arith.constant 0 : index
    %c0_14 = arith.constant 0 : index
    %c0_15 = arith.constant 0 : index
    %13 = vector.load %arg9[%c0_13, %c0_14, %c0_15] : memref<1x1x128xf32, #tpu.memory_space<vmem>>, vector<1x1x128xf32>
    %14 = vector.shape_cast %13 : vector<1x1x128xf32> to vector<1x128xf32>
    %c0_16 = arith.constant 0 : index
    %c0_17 = arith.constant 0 : index
    %c0_18 = arith.constant 0 : index
    %15 = vector.load %arg10[%c0_16, %c0_17, %c0_18] : memref<1x1x128xf32, #tpu.memory_space<vmem>>, vector<1x1x128xf32>
    %16 = vector.shape_cast %15 : vector<1x1x128xf32> to vector<1x128xf32>
    %17 = arith.truncf %4 : vector<16x128xf32> to vector<16x128xbf16>
    %cst = arith.constant dense<0.000000e+00> : vector<16x384xf32>
    %18 = tpu.matmul %17, %10, %cst {dimension_numbers = #tpu.dot_dimension_numbers<[1], [0], [0], [1], [0, 0, 1, 1], [], []>} : vector<16x128xbf16>, vector<128x384xbf16>, vector<16x384xf32> -> vector<16x384xf32>
    %19 = vector.extract_strided_slice %18 {offsets = [0, 0], sizes = [16, 128], strides = [1, 1]} : vector<16x384xf32> to vector<16x128xf32>
    %20 = vector.extract_strided_slice %18 {offsets = [0, 128], sizes = [16, 128], strides = [1, 1]} : vector<16x384xf32> to vector<16x128xf32>
    %21 = vector.extract_strided_slice %18 {offsets = [0, 256], sizes = [16, 128], strides = [1, 1]} : vector<16x384xf32> to vector<16x128xf32>
    %22 = vector.shape_cast %19 : vector<16x128xf32> to vector<16x4x32xf32>
    %23 = tpu.transpose %22, [1, 0, 2] : vector<16x4x32xf32> -> vector<4x16x32xf32>
    %24 = arith.truncf %23 : vector<4x16x32xf32> to vector<4x16x32xbf16>
    %25 = vector.shape_cast %20 : vector<16x128xf32> to vector<16x4x32xf32>
    %26 = tpu.transpose %25, [1, 0, 2] : vector<16x4x32xf32> -> vector<4x16x32xf32>
    %27 = arith.truncf %26 : vector<4x16x32xf32> to vector<4x16x32xbf16>
    %28 = vector.shape_cast %21 : vector<16x128xf32> to vector<16x4x32xf32>
    %29 = tpu.transpose %28, [1, 0, 2] : vector<16x4x32xf32> -> vector<4x16x32xf32>
    %30 = arith.truncf %29 : vector<4x16x32xf32> to vector<4x16x32xbf16>
    "tpu.trace_start"() <{level = 10 : i32, message = "hqd,hkd->hqk"}> : () -> ()
    %cst_19 = arith.constant dense<0.000000e+00> : vector<4x16x16xf32>
    %31 = tpu.matmul %24, %27, %cst_19 {dimension_numbers = #tpu.dot_dimension_numbers<[2], [2], [1], [1], [0, 0, 0, 1, 1, 1], [0], [0]>} : vector<4x16x32xbf16>, vector<4x16x32xbf16>, vector<4x16x16xf32> -> vector<4x16x16xf32>
    %cst_20 = arith.constant -1.000000e+09 : f32
    "tpu.trace_stop"() : () -> ()
    %32 = vector.shape_cast %8 : vector<1x16xi1> to vector<1x1x16xi1>
    %33 = vector.broadcast %32 : vector<1x1x16xi1> to vector<4x16x16xi1>
    %34 = vector.broadcast %cst_20 : f32 to vector<4x16x16xf32>
    %35 = arith.select %33, %31, %34 : vector<4x16x16xi1>, vector<4x16x16xf32>
    %cst_21 = arith.constant dense<0xFF800000> : vector<4x16xf32>
    %36 = vector.multi_reduction <maximumf>, %35, %cst_21 [2] : vector<4x16x16xf32> to vector<4x16xf32>
    %37 = vector.shape_cast %36 : vector<4x16xf32> to vector<4x16x1xf32>
    %38 = vector.broadcast %37 : vector<4x16x1xf32> to vector<4x16x16xf32>
    %39 = arith.subf %35, %38 : vector<4x16x16xf32>
    %40 = math.exp %39 : vector<4x16x16xf32>
    %cst_22 = arith.constant dense<0.000000e+00> : vector<4x16xf32>
    %41 = vector.multi_reduction <add>, %40, %cst_22 [2] : vector<4x16x16xf32> to vector<4x16xf32>
    %42 = vector.shape_cast %41 : vector<4x16xf32> to vector<4x16x1xf32>
    %43 = tpu.reciprocal %42 {approx = true} : vector<4x16x1xf32> -> vector<4x16x1xf32>
    %44 = vector.broadcast %43 : vector<4x16x1xf32> to vector<4x16x16xf32>
    %45 = arith.mulf %40, %44 : vector<4x16x16xf32>
    %46 = arith.truncf %45 : vector<4x16x16xf32> to vector<4x16x16xbf16>
    "tpu.trace_start"() <{level = 10 : i32, message = "hqk,hkd->hqd"}> : () -> ()
    %cst_23 = arith.constant dense<0.000000e+00> : vector<4x16x32xf32>
    %47 = tpu.matmul %46, %30, %cst_23 {dimension_numbers = #tpu.dot_dimension_numbers<[2], [1], [1], [2], [0, 0, 0, 1, 1, 2], [0], [0]>} : vector<4x16x16xbf16>, vector<4x16x32xbf16>, vector<4x16x32xf32> -> vector<4x16x32xf32>
    "tpu.trace_stop"() : () -> ()
    %48 = tpu.transpose %47, [1, 0, 2] : vector<4x16x32xf32> -> vector<16x4x32xf32>
    %49 = vector.shape_cast %48 : vector<16x4x32xf32> to vector<16x128xf32>
    %50 = arith.truncf %49 : vector<16x128xf32> to vector<16x128xbf16>
    %cst_24 = arith.constant dense<0.000000e+00> : vector<16x128xf32>
    %51 = tpu.matmul %50, %12, %cst_24 {dimension_numbers = #tpu.dot_dimension_numbers<[1], [0], [0], [1], [0, 0, 1, 1], [], []>} : vector<16x128xbf16>, vector<128x128xbf16>, vector<16x128xf32> -> vector<16x128xf32>
    %52 = arith.addf %51, %4 : vector<16x128xf32>
    %cst_25 = arith.constant dense<0.000000e+00> : vector<16xf32>
    %53 = vector.multi_reduction <add>, %52, %cst_25 [1] : vector<16x128xf32> to vector<16xf32>
    %54 = vector.shape_cast %53 : vector<16xf32> to vector<16x1xf32>
    %cst_26 = arith.constant 1.280000e+02 : f32
    %55 = vector.broadcast %cst_26 : f32 to vector<16x1xf32>
    %56 = arith.divf %54, %55 : vector<16x1xf32>
    %57 = vector.broadcast %56 : vector<16x1xf32> to vector<16x128xf32>
    %58 = arith.subf %52, %57 : vector<16x128xf32>
    %59 = arith.mulf %58, %58 : vector<16x128xf32>
    %cst_27 = arith.constant dense<0.000000e+00> : vector<16xf32>
    %60 = vector.multi_reduction <add>, %59, %cst_27 [1] : vector<16x128xf32> to vector<16xf32>
    %61 = vector.shape_cast %60 : vector<16xf32> to vector<16x1xf32>
    %cst_28 = arith.constant 1.280000e+02 : f32
    %62 = vector.broadcast %cst_28 : f32 to vector<16x1xf32>
    %63 = arith.divf %61, %62 : vector<16x1xf32>
    %64 = vector.broadcast %56 : vector<16x1xf32> to vector<16x128xf32>
    %65 = arith.subf %52, %64 : vector<16x128xf32>
    %cst_29 = arith.constant 9.99999997E-7 : f32
    %66 = vector.broadcast %cst_29 : f32 to vector<16x1xf32>
    %67 = arith.addf %63, %66 : vector<16x1xf32>
    %68 = math.rsqrt %67 : vector<16x1xf32>
    %69 = vector.broadcast %68 : vector<16x1xf32> to vector<16x128xf32>
    %70 = arith.mulf %65, %69 : vector<16x128xf32>
    %71 = vector.broadcast %14 : vector<1x128xf32> to vector<16x128xf32>
    %72 = arith.mulf %70, %71 : vector<16x128xf32>
    %73 = vector.broadcast %16 : vector<1x128xf32> to vector<16x128xf32>
    %74 = arith.addf %72, %73 : vector<16x128xf32>
    %c0_30 = arith.constant 0 : index
    %c0_31 = arith.constant 0 : index
    %c0_32 = arith.constant 0 : index
    %75 = vector.load %arg11[%c0_30, %c0_31, %c0_32] : memref<1x128x256xbf16, #tpu.memory_space<vmem>>, vector<1x128x256xbf16>
    %76 = vector.shape_cast %75 : vector<1x128x256xbf16> to vector<128x256xbf16>
    %c0_33 = arith.constant 0 : index
    %c0_34 = arith.constant 0 : index
    %c0_35 = arith.constant 0 : index
    %77 = vector.load %arg12[%c0_33, %c0_34, %c0_35] : memref<1x1x256xf32, #tpu.memory_space<vmem>>, vector<1x1x256xf32>
    %78 = vector.shape_cast %77 : vector<1x1x256xf32> to vector<1x256xf32>
    %c0_36 = arith.constant 0 : index
    %c0_37 = arith.constant 0 : index
    %c0_38 = arith.constant 0 : index
    %79 = vector.load %arg13[%c0_36, %c0_37, %c0_38] : memref<1x256x128xbf16, #tpu.memory_space<vmem>>, vector<1x256x128xbf16>
    %80 = vector.shape_cast %79 : vector<1x256x128xbf16> to vector<256x128xbf16>
    %c0_39 = arith.constant 0 : index
    %c0_40 = arith.constant 0 : index
    %c0_41 = arith.constant 0 : index
    %81 = vector.load %arg14[%c0_39, %c0_40, %c0_41] : memref<1x1x128xf32, #tpu.memory_space<vmem>>, vector<1x1x128xf32>
    %82 = vector.shape_cast %81 : vector<1x1x128xf32> to vector<1x128xf32>
    %c0_42 = arith.constant 0 : index
    %c0_43 = arith.constant 0 : index
    %c0_44 = arith.constant 0 : index
    %83 = vector.load %arg15[%c0_42, %c0_43, %c0_44] : memref<1x1x128xf32, #tpu.memory_space<vmem>>, vector<1x1x128xf32>
    %84 = vector.shape_cast %83 : vector<1x1x128xf32> to vector<1x128xf32>
    %c0_45 = arith.constant 0 : index
    %c0_46 = arith.constant 0 : index
    %c0_47 = arith.constant 0 : index
    %85 = vector.load %arg16[%c0_45, %c0_46, %c0_47] : memref<1x1x128xf32, #tpu.memory_space<vmem>>, vector<1x1x128xf32>
    %86 = vector.shape_cast %85 : vector<1x1x128xf32> to vector<1x128xf32>
    %87 = arith.truncf %74 : vector<16x128xf32> to vector<16x128xbf16>
    %cst_48 = arith.constant dense<0.000000e+00> : vector<16x256xf32>
    %88 = tpu.matmul %87, %76, %cst_48 {dimension_numbers = #tpu.dot_dimension_numbers<[1], [0], [0], [1], [0, 0, 1, 1], [], []>} : vector<16x128xbf16>, vector<128x256xbf16>, vector<16x256xf32> -> vector<16x256xf32>
    %89 = vector.broadcast %78 : vector<1x256xf32> to vector<16x256xf32>
    %90 = arith.addf %88, %89 : vector<16x256xf32>
    %cst_49 = arith.constant 0.000000e+00 : f32
    %91 = vector.broadcast %cst_49 : f32 to vector<16x256xf32>
    %92 = arith.maximumf %90, %91 : vector<16x256xf32>
    %93 = arith.truncf %92 : vector<16x256xf32> to vector<16x256xbf16>
    %cst_50 = arith.constant dense<0.000000e+00> : vector<16x128xf32>
    %94 = tpu.matmul %93, %80, %cst_50 {dimension_numbers = #tpu.dot_dimension_numbers<[1], [0], [0], [1], [0, 0, 1, 1], [], []>} : vector<16x256xbf16>, vector<256x128xbf16>, vector<16x128xf32> -> vector<16x128xf32>
    %95 = vector.broadcast %82 : vector<1x128xf32> to vector<16x128xf32>
    %96 = arith.addf %94, %95 : vector<16x128xf32>
    %97 = arith.addf %96, %74 : vector<16x128xf32>
    %cst_51 = arith.constant dense<0.000000e+00> : vector<16xf32>
    %98 = vector.multi_reduction <add>, %97, %cst_51 [1] : vector<16x128xf32> to vector<16xf32>
    %99 = vector.shape_cast %98 : vector<16xf32> to vector<16x1xf32>
    %cst_52 = arith.constant 1.280000e+02 : f32
    %100 = vector.broadcast %cst_52 : f32 to vector<16x1xf32>
    %101 = arith.divf %99, %100 : vector<16x1xf32>
    %102 = vector.broadcast %101 : vector<16x1xf32> to vector<16x128xf32>
    %103 = arith.subf %97, %102 : vector<16x128xf32>
    %104 = arith.mulf %103, %103 : vector<16x128xf32>
    %cst_53 = arith.constant dense<0.000000e+00> : vector<16xf32>
    %105 = vector.multi_reduction <add>, %104, %cst_53 [1] : vector<16x128xf32> to vector<16xf32>
    %106 = vector.shape_cast %105 : vector<16xf32> to vector<16x1xf32>
    %cst_54 = arith.constant 1.280000e+02 : f32
    %107 = vector.broadcast %cst_54 : f32 to vector<16x1xf32>
    %108 = arith.divf %106, %107 : vector<16x1xf32>
    %109 = vector.broadcast %101 : vector<16x1xf32> to vector<16x128xf32>
    %110 = arith.subf %97, %109 : vector<16x128xf32>
    %cst_55 = arith.constant 9.99999997E-7 : f32
    %111 = vector.broadcast %cst_55 : f32 to vector<16x1xf32>
    %112 = arith.addf %108, %111 : vector<16x1xf32>
    %113 = math.rsqrt %112 : vector<16x1xf32>
    %114 = vector.broadcast %113 : vector<16x1xf32> to vector<16x128xf32>
    %115 = arith.mulf %110, %114 : vector<16x128xf32>
    %116 = vector.broadcast %84 : vector<1x128xf32> to vector<16x128xf32>
    %117 = arith.mulf %115, %116 : vector<16x128xf32>
    %118 = vector.broadcast %86 : vector<1x128xf32> to vector<16x128xf32>
    %119 = arith.addf %117, %118 : vector<16x128xf32>
    %c0_56 = arith.constant 0 : index
    %c0_57 = arith.constant 0 : index
    %c0_58 = arith.constant 0 : index
    %120 = vector.load %arg17[%c0_56, %c0_57, %c0_58] : memref<1x16x128xf32, #tpu.memory_space<vmem>>, vector<1x16x128xf32>
    %121 = vector.shape_cast %120 : vector<1x16x128xf32> to vector<16x128xf32>
    %122 = vector.shape_cast %119 : vector<16x128xf32> to vector<1x16x128xf32>
    tpu.vector_store %arg17[%c0_56, %c0_57, %c0_58], %122 {strides = array<i32>} : memref<1x16x128xf32, #tpu.memory_space<vmem>>, vector<1x16x128xf32>,
    return
  }
  func.func @transform_0(%arg0: i32, %arg1: i32) -> (i32, i32, i32) {
    %c0_i32 = arith.constant 0 : i32
    %c0_i32_0 = arith.constant 0 : i32
    %c0_i32_1 = arith.constant 0 : i32
    return %arg0, %c0_i32, %c0_i32_0 : i32, i32, i32
  }
  func.func @transform_1(%arg0: i32, %arg1: i32) -> (i32, i32, i32) {
    %c0_i32 = arith.constant 0 : i32
    %c0_i32_0 = arith.constant 0 : i32
    %c0_i32_1 = arith.constant 0 : i32
    return %arg0, %c0_i32, %c0_i32_0 : i32, i32, i32
  }
  func.func @transform_2(%arg0: i32, %arg1: i32) -> (i32, i32) {
    %c0_i32 = arith.constant 0 : i32
    %c0_i32_0 = arith.constant 0 : i32
    %c0_i32_1 = arith.constant 0 : i32
    return %c0_i32, %c0_i32_0 : i32, i32
  }
  func.func @transform_3(%arg0: i32, %arg1: i32) -> (i32, i32) {
    %c0_i32 = arith.constant 0 : i32
    %c0_i32_0 = arith.constant 0 : i32
    %c0_i32_1 = arith.constant 0 : i32
    return %c0_i32, %c0_i32_0 : i32, i32
  }
  func.func @transform_4(%arg0: i32, %arg1: i32) -> (i32, i32) {
    %c0_i32 = arith.constant 0 : i32
    %c0_i32_0 = arith.constant 0 : i32
    %c0_i32_1 = arith.constant 0 : i32
    return %c0_i32, %c0_i32_0 : i32, i32
  }
  func.func @transform_5(%arg0: i32, %arg1: i32) -> (i32, i32, i32) {
    %c0_i32 = arith.constant 0 : i32
    %c0_i32_0 = arith.constant 0 : i32
    %c0_i32_1 = arith.constant 0 : i32
    return %arg1, %c0_i32, %c0_i32_0 : i32, i32, i32
  }
  func.func @transform_6(%arg0: i32, %arg1: i32) -> (i32, i32, i32) {
    %c0_i32 = arith.constant 0 : i32
    %c0_i32_0 = arith.constant 0 : i32
    %c0_i32_1 = arith.constant 0 : i32
    return %arg1, %c0_i32, %c0_i32_0 : i32, i32, i32
  }
  func.func @transform_7(%arg0: i32, %arg1: i32) -> (i32, i32, i32) {
    %c0_i32 = arith.constant 0 : i32
    %c0_i32_0 = arith.constant 0 : i32
    %c0_i32_1 = arith.constant 0 : i32
    return %arg1, %c0_i32, %c0_i32_0 : i32, i32, i32
  }
  func.func @transform_8(%arg0: i32, %arg1: i32) -> (i32, i32, i32) {
    %c0_i32 = arith.constant 0 : i32
    %c0_i32_0 = arith.constant 0 : i32
    %c0_i32_1 = arith.constant 0 : i32
    return %arg1, %c0_i32, %c0_i32_0 : i32, i32, i32
  }
  func.func @transform_9(%arg0: i32, %arg1: i32) -> (i32, i32, i32) {
    %c0_i32 = arith.constant 0 : i32
    %c0_i32_0 = arith.constant 0 : i32
    %c0_i32_1 = arith.constant 0 : i32
    return %arg1, %c0_i32, %c0_i32_0 : i32, i32, i32
  }
  func.func @transform_10(%arg0: i32, %arg1: i32) -> (i32, i32, i32) {
    %c0_i32 = arith.constant 0 : i32
    %c0_i32_0 = arith.constant 0 : i32
    %c0_i32_1 = arith.constant 0 : i32
    return %arg1, %c0_i32, %c0_i32_0 : i32, i32, i32
  }
  func.func @transform_11(%arg0: i32, %arg1: i32) -> (i32, i32, i32) {
    %c0_i32 = arith.constant 0 : i32
    %c0_i32_0 = arith.constant 0 : i32
    %c0_i32_1 = arith.constant 0 : i32
    return %arg1, %c0_i32, %c0_i32_0 : i32, i32, i32
  }
  func.func @transform_12(%arg0: i32, %arg1: i32) -> (i32, i32, i32) {
    %c0_i32 = arith.constant 0 : i32
    %c0_i32_0 = arith.constant 0 : i32
    %c0_i32_1 = arith.constant 0 : i32
    return %arg1, %c0_i32, %c0_i32_0 : i32, i32, i32
  }
  func.func @transform_13(%arg0: i32, %arg1: i32) -> (i32, i32, i32) {
    %c0_i32 = arith.constant 0 : i32
    %c0_i32_0 = arith.constant 0 : i32
    %c0_i32_1 = arith.constant 0 : i32
    return %arg1, %c0_i32, %c0_i32_0 : i32, i32, i32
  }
  func.func @transform_14(%arg0: i32, %arg1: i32) -> (i32, i32, i32) {
    %c0_i32 = arith.constant 0 : i32
    %c0_i32_0 = arith.constant 0 : i32
    %c0_i32_1 = arith.constant 0 : i32
    return %arg1, %c0_i32, %c0_i32_0 : i32, i32, i32
  }
  func.func @transform_15(%arg0: i32, %arg1: i32) -> (i32, i32, i32) {
    %c0_i32 = arith.constant 0 : i32
    %c0_i32_0 = arith.constant 0 : i32
    %c0_i32_1 = arith.constant 0 : i32
    return %arg0, %c0_i32, %c0_i32_0 : i32, i32, i32
  }
}

</mosaic_0001>

<bundles_post_ra>
// kernel: tpu_custom_call.1
= control target key start
LH: loop header
LB: loop body
LE: loop exit
PB: predicated region body
PF: predicated region fallthrough
CT: control target
= control target key end

     0   :  { %s5626_s0 = inlined_call_operand.hbm [shape: f32[2,16,128], index: 0, kind: input, shape index: {}]   ;;  %s5627_s1 = inlined_call_operand.hbm [shape: s32[2,1,16], index: 1, kind: input, shape index: {}]   ;;  %s5628_s2 = inlined_call_operand.hbm [shape: f32[16,128], index: 2, kind: input, shape index: {}]   ;;  %s5629_s3 = inlined_call_operand.hbm [shape: f32[1,128], index: 3, kind: input, shape index: {}]   ;;  %s5630_s4 = inlined_call_operand.hbm [shape: f32[1,128], index: 4, kind: input, shape index: {}]   ;;  %s5631_s5 = inlined_call_operand.hbm [shape: bf16[2,128,384], index: 5, kind: input, shape index: {}]   ;;  %s5632_s6 = inlined_call_operand.hbm [shape: bf16[2,128,128], index: 6, kind: input, shape index: {}]   ;;  %s5633_s7 = inlined_call_operand.vmem [shape: f32[2,1,128], index: 7, kind: input, shape index: {}]   ;;  %s5634_s8 = inlined_call_operand.hbm [shape: f32[2,1,128], index: 8, kind: input, shape index: {}]   ;;  %s5635_s9 = inlined_call_operand.hbm [shape: bf16[2,128,256], index: 9, kind: input, shape index: {}]   ;;  %s5636_s10 = inlined_call_operand.vmem [shape: f32[2,1,256], index: 10, kind: input, shape index: {}]   ;;  %s5637_s11 = inlined_call_operand.hbm [shape: bf16[2,256,128], index: 11, kind: input, shape index: {}]   ;;  %s5638_s12 = inlined_call_operand.vmem [shape: f32[2,1,128], index: 12, kind: input, shape index: {}]   ;;  %s5639_s13 = inlined_call_operand.vmem [shape: f32[2,1,128], index: 13, kind: input, shape index: {}]   ;;  %s5640_s14 = inlined_call_operand.vmem [shape: f32[2,1,128], index: 14, kind: input, shape index: {}]   ;;  %s5641_s15 = inlined_call_operand.hbm [shape: f32[2,16,128], index: 15, kind: output, shape index: {}]  }
   0x1   :  { %5665 = sst [smem:[#allocation44_spill]] %s5626_s0 }
   0x2   :  { %5666 = sst [smem:[#allocation45_spill]] %s5627_s1 }
   0x3   :  { %5667 = sst [smem:[#allocation46_spill]] %s5628_s2 }
   0x4   :  { %5668 = sst [smem:[#allocation47_spill]] %s5629_s3 }
   0x5   :  { %5669 = sst [smem:[#allocation48_spill]] %s5630_s4 }
   0x6   :  { %5670 = sst [smem:[#allocation49_spill]] %s5631_s5 }
   0x7   :  { %5671 = sst [smem:[#allocation50_spill]] %s5632_s6 }
   0x8   :  { %5672 = sst [smem:[#allocation51_spill]] %s5633_s7 }
   0x9   :  { %5673 = sst [smem:[#allocation52_spill]] %s5634_s8 }
   0xa   :  { %5674 = sst [smem:[#allocation53_spill]] %s5635_s9 }
   0xb   :  { %5675 = sst [smem:[#allocation54_spill]] %s5636_s10 }
   0xc   :  { %5676 = sst [smem:[#allocation55_spill]] %s5637_s11 }
   0xd   :  { %5677 = sst [smem:[#allocation56_spill]] %s5638_s12 }
   0xe   :  { %5678 = sst [smem:[#allocation57_spill]] %s5639_s13 }
   0xf   :  { %5679 = sst [smem:[#allocation58_spill]] %s5640_s14 }
  0x10   :  { %5680 = sst [smem:[#allocation59_spill]] %s5641_s15 }
  0x11   :  { %20 = vsyncpa [#allocation3], 0 }
  0x12   :  { %22 = vsyncpa [#allocation3 + $0x1], 0 }
  0x13   :  { %23 = vsyncpa [#allocation6], 0 }
  0x14   :  { %25 = vsyncpa [#allocation6 + $0x1], 0 }
  0x15   :  { %26 = vsyncpa [#allocation9], 0 }
  0x16   :  { %27 = vsyncpa [#allocation12], 0 }
  0x17   :  { %29 = vsyncpa [#allocation12 + $0x1], 0 }
  0x18   :  { %30 = vsyncpa [#allocation15], 0 }
  0x19   :  { %32 = vsyncpa [#allocation15 + $0x1], 0 }
  0x1a   :  { %33 = vsyncpa [#allocation18], 0 }
  0x1b   :  { %35 = vsyncpa [#allocation18 + $0x1], 0 }
  0x1c   :  { %36 = vsyncpa [#allocation4], 0 }
  0x1d   :  { %38 = vsyncpa [#allocation4 + $0x1], 0  ;;  %s4502_s18 = smov 0   ;;  %s4504_s19 = smov 0  }
  0x1e   :  { %s4506_s20 = smov 0   ;;  %s4508_s21 = smov 0  }
  0x1f   :  { %s4510_s22 = smov 0   ;;  %s4512_s23 = smov 0  }
  0x20   :  { %s4514_s24 = smov 0   ;;  %s4516_s25 = smov 0  }
  0x21   :  { %s4518_s26 = smov 0   ;;  %s4520_s27 = smov 0  }
  0x22   :  { %s4522_s28 = smov 0  }
  0x23 LB: > { %5681 = sst [smem:[#allocation28_spill]] %s4365_s19  ;;  %s4556_s29 = sadd.s32 4294967295, %s4401_s28   ;;  %s4401_s28 = sphi %s4522_s28, %s44_s28   ;;  %s4397_s27 = sphi %s4520_s27, %s5753_s27   ;;  %s4393_s26 = sphi %s4518_s26, %s5752_s26   ;;  %s4389_s25 = sphi %s4516_s25, %s5751_s25   ;;  %s4385_s24 = sphi %s4514_s24, %s5750_s24   ;;  %s4381_s23 = sphi %s4512_s23, %s5749_s23   ;;  %s4377_s22 = sphi %s4510_s22, %s5748_s22   ;;  %s4373_s21 = sphi %s4508_s21, %s5747_s21   ;;  %s4369_s20 = sphi %s4506_s20, %s5746_s20   ;;  %s4365_s19 = sphi %s4504_s19, %s5745_s19   ;;  %s4361_s18 = sphi %s4502_s18, %s5744_s18  }
  0x24   : > { %5682 = sst [smem:[#allocation29_spill]] %s4369_s20  ;;  %p191_p0 = scmp.ne.s32.totalorder %s4365_s19, %s4361_s18 }
  0x25   : > { %5683 = sst [smem:[#allocation30_spill]] %s4373_s21  ;;  %p77_p1 = scmp.eq.s32.totalorder %s4556_s29, 0 }
  0x26   : > { %5684 = sst [smem:[#allocation31_spill]] %s4377_s22  ;;  %p449_p2 = scmp.eq.s32.totalorder %s4556_s29, 3 }
  0x27   : > { %5685 = sst [smem:[#allocation32_spill]] %s4381_s23  ;;  %p3289_p3 = scmp.ge.s32.totalorder %s4401_s28, 1 }
  0x28   : > { %5686 = sst [smem:[#allocation33_spill]] %s4385_s24  ;;  %p462_p4 = scmp.lt.s32.totalorder %s4401_s28, 5 }
  0x29   : > { %5687 = sst [smem:[#allocation34_spill]] %s4389_s25  ;;  %p4565_p5 = por %p191_p0, %p77_p1 }
  0x2a   : > { %5688 = sst [smem:[#allocation35_spill]] %s4393_s26  ;;  %p4569_p6 = pnand %p3289_p3, %p462_p4 }
  0x2b   : > { %5689 = sst [smem:[#allocation36_spill]] %s4397_s27  ;;  %s4403_s18 = smov [#allocation7]  }
  0x2c   : > { %s5690_s30 = scalar_select %p4565_p5, 1, 0 }
  0x2d   : > { %s5692_s16 = scalar_select %p4569_p6, 1, 0 }
  0x2e   : > { %5691 = sst [smem:[#allocation37_spill]] %s5690_s30  ;;  %p3687_p7 = pneg %p4569_p6 }
  0x2f   : > { %5693 = sst [smem:[#allocation38_spill]] %s5692_s16  ;;  %s475_s14 = sshll.u32 %s4403_s18, 4  ;;  %s476_s14 = int_to_ptr.vmem [resolvable:$true] %s475_s14 }
  0x30   : > { %s5694_s2 = sld [smem:[#allocation46_spill]]  ;;  %p4580_p8 = pnand %p3687_p7, %p77_p1 }
  0x31   : > { %s5696_s3 = sld [smem:[#allocation47_spill]]  ;;  %s5645_s18 = smov 8  }
  0x32   : > { %s4406_s10 = smov [#allocation8]   ;;  %s53_s12 = sadd.s32 1, %s4393_s26 }
  0x33   : > { %s490_s7 = sshll.u32 %s4406_s10, 4  ;;  %p4595_p9 = scmp.ge.s32.totalorder %s53_s12, 2  ;;  %s491_s7 = int_to_ptr.vmem [resolvable:$true] %s490_s7 }
  0x34   : > { %p71_p10 = scmp.eq.s32.totalorder %s4401_s28, 0  ;;  %p185_p11 = scmp.ne.s32.totalorder %s4369_s20, %s4365_s19 }
  0x35   : > { %s5755_s12 = smov (%p4595_p9, %s53_s12), 0  ;;  %p5654_p13 = scmp.lt.s32.totalorder %s4401_s28, 4 }
  0x36   : > { %s473_s25 = sshll.u32 %s5694_s2, 4  ;;  %s5643_s2 = smov 128   ;;  %s474_s25 = int_to_ptr.hbm [resolvable:$true] %s473_s25 }
  0x37   : > { %s488_s17 = sshll.u32 %s5696_s3, 4  ;;  %s178_s3 = sadd.s32 1, %s4369_s20  ;;  %s489_s17 = int_to_ptr.hbm [resolvable:$true] %s488_s17 }
  0x38   : > { %3690 = dma.hbm_to_vmem [thread:$0]  (!%p4580_p8), %s474_s25, 256, %s476_s14, [#allocation6], %s5643_s2, %s5643_s2, %s5645_s18  }
  0x39   : > { %3693 = dma.hbm_to_vmem [thread:$0]  (!%p4580_p8), %s489_s17, 16, %s491_s7, [#allocation9]  }
  0x3a   : > { %5698 = sst [smem:[#allocation39_spill]] %s5755_s12  ;;  %p187_p12 = por %p185_p11, %p71_p10 }
  0x3b   : > { %s175_s10 = ssub.s32 %s4393_s26, %s5755_s12  ;;  %s4613_s14 = sand.u32 1, %s4401_s28  }
  0x3c   : > { %p176_p0 = scmp.eq.s32.totalorder %s175_s10, 0  ;;  %s4616_s7 = sand.u32 1, %s4369_s20  }
  0x3d   : > { %s3657_s25 = smul.u32 192, %s4393_s26  ;;  %s5700_s5 = sld [smem:[#allocation49_spill]] }
  0x3e   : > { %s4620_s17 = scalar_select %p176_p0, %s4369_s20, %s178_s3  }
  0x3f   : > { %s3656_s2 = smul.u32 192, %s4616_s7  ;;  %p4628_p3 = pnand %p5654_p13, %p187_p12 }
  0x40   : > { %5699 = sst [smem:[#allocation40_spill]] %s4620_s17  ;;  %s5656_s3 = scalar_lea.sflag [#allocation12], %s4613_s14 }
  0x41   : > { %s556_s10 = scalar_lea.vmem [#allocation11], %s3656_s2  ;;  %s4407_s17 = smov 192  }
  0x42   : > { %s564_s16 = sshll.u32 %s556_s10, 4  ;;  %s4408_s20 = smov 12   ;;  %s565_s16 = int_to_ptr.vmem [resolvable:$true] %s564_s16 }
  0x43   : > { %s561_s30 = scalar_lea.hbm %s5700_s5, %s3657_s25  ;;  %s5702_s8 = sld [smem:[#allocation52_spill]] }
  0x44   : > { %s562_s19 = sshll.u32 %s561_s30, 4  ;;  %s605_s2 = scalar_lea.vmem [#allocation14], %s4616_s7  ;;  %s563_s19 = int_to_ptr.hbm [resolvable:$true] %s562_s19 }
  0x45   : > { %3706 = dma.hbm_to_vmem [thread:$0]  (!%p4628_p3), %s563_s19, 3072, %s565_s16, %s5656_s3, %s4407_s17, %s4407_s17, %s4408_s20  }
  0x46   : > { %s612_s10 = sshll.u32 %s605_s2, 4  ;;  %s5655_s5 = scalar_lea.sflag [#allocation15], %s4613_s14  ;;  %s613_s10 = int_to_ptr.vmem [resolvable:$true] %s612_s10 }
  0x47   : > { %s5703_s4 = sld [smem:[#allocation48_spill]]  ;;  %s4409_s17 = smov [#allocation10]  }
  0x48   : > { %s502_s24 = sshll.u32 %s4409_s17, 4  ;;  %s3288_s30 = sadd.s32 4294967294, %s4401_s28   ;;  %s503_s24 = int_to_ptr.vmem [resolvable:$true] %s502_s24 }
  0x49   : > { %s608_s18 = scalar_lea.hbm %s5702_s8, %s4393_s26  ;;  %s63_s2 = sadd.s32 1, %s4381_s23 }
  0x4a   : > { %s610_s25 = sshll.u32 %s608_s18, 4  ;;  %s56_s18 = sadd.s32 1, %s4397_s27  ;;  %s611_s25 = int_to_ptr.hbm [resolvable:$true] %s610_s25 }
  0x4b   : > { %3712 = dma.hbm_to_vmem [thread:$0]  (!%p4628_p3), %s611_s25, 16, %s613_s10, %s5655_s5  }
  0x4c   : > { %s5757_s18 = smov (!%p4595_p9, %s56_s18), %s4397_s27  ;;  %p70_p4 = scmp.ne.s32.totalorder %s4381_s23, %s4377_s22 }
  0x4d   : > { %s500_s16 = sshll.u32 %s5703_s4, 4  ;;  %p76_p7 = scmp.ne.s32.totalorder %s4377_s22, %s4373_s21  ;;  %s501_s16 = int_to_ptr.hbm [resolvable:$true] %s500_s16 }
  0x4e   : > { %3696 = dma.hbm_to_vmem [thread:$0]  (!%p4580_p8), %s501_s16, 16, %s503_s24, [#allocation9]  }
  0x4f   : > { %p58_p11 = scmp.ge.s32.totalorder %s5757_s18, 2  ;;  %p455_p12 = scmp.eq.s32.totalorder %s3288_s30, 3 }
  0x50   : > { %p4664_p0 = por %p71_p10, %p70_p4  ;;  %p4670_p13 = por %p77_p1, %p76_p7 }
  0x51   : > { %s5759_s18 = smov (%p58_p11, %s5757_s18), 0  ;;  %p4678_p8 = por %p449_p2, %p70_p4 }
  0x52   : > { %5706 = sst [smem:[#allocation41_spill]] %s5759_s18  ;;  %p4682_p9 = por %p455_p12, %p76_p7 }
  0x53   : > { %s60_s19 = ssub.s32 %s4397_s27, %s5759_s18  ;;  %s513_s20 = sand.u32 1, %s4381_s23  }
  0x54   : > { %s5708_s10 = scalar_select %p4682_p9, 1, 0 }
  0x55   : > { %p61_p10 = scmp.eq.s32.totalorder %s60_s19, 0  ;;  %s3294_s16 = sshll.u32 %s513_s20, 4 }
  0x56   : > { %5709 = sst [smem:[#allocation42_spill]] %s5708_s10  ;;  %s3587_s17 = sshll.u32 %s4397_s27, 4 }
  0x57   : > { %s4691_s24 = scalar_select %p61_p10, %s4381_s23, %s63_s2  }
  0x58   : > { %s5711_s0 = sld [smem:[#allocation44_spill]]  ;;  %s517_s8 = scalar_lea.vmem [#allocation2], %s3294_s16 }
  0x59   : > { %5710 = sst [smem:[#allocation43_spill]] %s4691_s24  ;;  %s525_s21 = sshll.u32 %s517_s8, 4  ;;  %s526_s21 = int_to_ptr.vmem [resolvable:$true] %s525_s21 }
  0x5a   : > { %p5712_p2 = scmp.lt.s32.totalorder %s4401_s28, 4  ;;  %s5713_s1 = sld [smem:[#allocation45_spill]] }
  0x5b   : > { %s514_s23 = scalar_lea.sflag [#allocation3], %s513_s20  ;;  %s5714_s10 = smov 8  }
  0x5c   : > { %p3698_p4 = pnand %p5712_p2, %p4664_p0  ;;  %s5715_s5 = smov 128  }
  0x5d   : > { %s3298_s25 = sshll.u32 %s4616_s7, 6  ;;  %s536_s16 = scalar_lea.sflag [#allocation6], %s4613_s14 }
  0x5e   : > { %s522_s3 = scalar_lea.hbm %s5711_s0, %s3587_s17  ;;  %s3588_s17 = sshll.u32 %s4393_s26, 6 }
  0x5f   : > { %s523_s4 = sshll.u32 %s522_s3, 4  ;;  %s538_s3 = scalar_lea.vmem [#allocation5], %s513_s20  ;;  %s524_s4 = int_to_ptr.hbm [resolvable:$true] %s523_s4 }
  0x60   : > { %s541_s2 = scalar_lea.hbm %s5713_s1, %s4397_s27  ;;  %s545_s8 = sshll.u32 %s538_s3, 4  ;;  %s546_s8 = int_to_ptr.vmem [resolvable:$true] %s545_s8 }
  0x61   : > { %s543_s24 = sshll.u32 %s541_s2, 4  ;;  %s5716_s6 = sld [smem:[#allocation50_spill]]  ;;  %s544_s24 = int_to_ptr.hbm [resolvable:$true] %s543_s24 }
  0x62   : > { %3700 = dma.hbm_to_vmem [thread:$0]  (!%p3698_p4), %s524_s4, 256, %s526_s21, %s514_s23, %s5715_s5, %s5715_s5, %s5714_s10  }
  0x63   : > { %3703 = dma.hbm_to_vmem [thread:$0]  (!%p3698_p4), %s544_s24, 16, %s546_s8, %s536_s16  }
  0x64   : > { %s578_s2 = scalar_lea.vmem [#allocation13], %s3298_s25  ;;  %s3301_s21 = sshll.u32 %s4616_s7, 7 }
  0x65   : > { %s586_s0 = sshll.u32 %s578_s2, 4  ;;  %s4410_s23 = smov 64   ;;  %s587_s0 = int_to_ptr.vmem [resolvable:$true] %s586_s0 }
  0x66   : > { %s4411_s20 = smov 4   ;;  %s5717_s3 = scalar_lea.sflag [#allocation12], %s4613_s14 }
  0x67   : > { %s583_s19 = scalar_lea.hbm %s5716_s6, %s3588_s17  ;;  %s3589_s24 = sshll.u32 %s4393_s26, 7 }
  0x68   : > { %s584_s4 = sshll.u32 %s583_s19, 4  ;;  %s5718_s9 = sld [smem:[#allocation53_spill]]  ;;  %s585_s4 = int_to_ptr.hbm [resolvable:$true] %s584_s4 }
  0x69   : > { %3709 = dma.hbm_to_vmem [thread:$0]  (!%p4628_p3), %s585_s4, 1024, %s587_s0, %s5717_s3, %s4410_s23, %s4410_s23, %s4411_s20  }
  0x6a   : > { %s623_s25 = scalar_lea.vmem [#allocation16], %s3301_s21  ;;  %s5719_s19 = scalar_lea.sflag [#allocation15], %s4613_s14 }
  0x6b   : > { %s631_s18 = sshll.u32 %s623_s25, 4  ;;  %s5720_s11 = sld [smem:[#allocation55_spill]]  ;;  %s632_s18 = int_to_ptr.vmem [resolvable:$true] %s631_s18 }
  0x6c   : > { %s652_s3 = scalar_lea.vmem [#allocation17], %s3301_s21  ;;  %s649_s8 = scalar_lea.sflag [#allocation18], %s4616_s7 }
  0x6d   : > { %s660_s6 = sshll.u32 %s652_s3, 4  ;;  %s661_s6 = int_to_ptr.vmem [resolvable:$true] %s660_s6 }
  0x6e   : > { %s628_s17 = scalar_lea.hbm %s5718_s9, %s3589_s24 }
  0x6f   : > { %s629_s30 = sshll.u32 %s628_s17, 4  ;;  %690 = sbr.rel (%p4569_p6) target bundleno = 2484 (0x9b4), region = 80  ;;  %s630_s30 = int_to_ptr.hbm [resolvable:$true] %s629_s30 }
  0x70   : > { %3715 = dma.hbm_to_vmem [thread:$0]  (!%p4628_p3), %s630_s30, 2048, %s632_s18, %s5719_s19, %s5715_s5, %s5715_s5, %s5714_s10  }
  0x71   : > { %s657_s0 = scalar_lea.hbm %s5720_s11, %s3589_s24  ;;  %s4738_s17 = sand.u32 (!%p4569_p6), 1, %s4377_s22  }
  0x72   : > { %s658_s4 = sshll.u32 %s657_s0, 4  ;;  %s5661_s1 = sshll.u32 (!%p4569_p6), %s4738_s17, 4  ;;  %s659_s4 = int_to_ptr.hbm [resolvable:$true] %s658_s4 }
  0x73   : > { %3718 = dma.hbm_to_vmem [thread:$0]  (!%p4628_p3), %s659_s4, 2048, %s661_s6, %s649_s8, %s4410_s23, %s4410_s23, %s4411_s20  }
  0x74   : > { %s693_s14 = scalar_lea.sflag [#allocation3], %s4738_s17  ;;  %s4744_s10 = scalar_lea.vmem [#allocation2], %s5661_s1 }
  0x75   : > { %4328 = dma.done.wait (%p4670_p13), %s693_s14, 256  }
  0x76   : > { %4330 = vsyncadd (%p4670_p13), %s693_s14, 4294967040  ;;  %s702_s6 = sand.u32 1, %s4556_s29  }
  0x77   : > { %s703_s12 = scalar_lea.sflag [#allocation6], %s702_s6 }
  0x78   : > { %4332 = dma.done.wait (%p4670_p13), %s703_s12, 16  }
  0x79   : > { %4334 = vsyncadd (%p4670_p13), %s703_s12, 4294967280 }
  0x7a   : > { %4336 = dma.done.wait (%p77_p1), [#allocation6], 256  }
  0x7b   : > { %4338 = vsyncadd (%p77_p1), [#allocation6], 4294967040 }
  0x7c   : > { %4340 = dma.done.wait (%p77_p1), [#allocation9], 32  }
  0x7d   : > { %4342 = vsyncadd (%p77_p1), [#allocation9], 4294967264  ;;  %s5722_s5 = sld [smem:[#allocation28_spill]]  ;;  %s727_s13 = scalar_lea.sflag [#allocation12], %s702_s6 }
  0x83   : > { %s4765_s23 = sand.u32 1, %s5722_s5  }
  0x84   : > { %s3658_s20 = smul.u32 192, %s4765_s23 }
  0x86   : > { %s4768_s24 = scalar_lea.vmem [#allocation11], %s3658_s20 }
  0x87   : > { %4344 = dma.done.wait (%p4565_p5), %s727_s13, 4096  }
  0x88   : > { %4346 = vsyncadd (%p4565_p5), %s727_s13, 4294963200  ;;  %s3312_s25 = sshll.u32 %s4765_s23, 6  ;;  %s747_s18 = scalar_lea.sflag [#allocation15], %s702_s6 }
  0x89   : > { %s4775_s29 = scalar_lea.vmem [#allocation13], %s3312_s25 }
  0x8a   : > { %4348 = dma.done.wait (%p4565_p5), %s747_s18, 2064  }
  0x8b   : > { %4350 = vsyncadd (%p4565_p5), %s747_s18, 4294965232  ;;  %s3313_s19 = sshll.u32 %s4765_s23, 7  ;;  %s766_s0 = scalar_lea.sflag [#allocation18], %s4765_s23 }
  0x8c   : > { %s4783_s2 = scalar_lea.vmem [#allocation16], %s3313_s19  ;;  %s4786_s4 = scalar_lea.vmem [#allocation17], %s3313_s19 }
  0x8d   : > { %4352 = dma.done.wait (%p4565_p5), %s766_s0, 2048  }
  0x8e   : > { %4354 = vsyncadd (%p4565_p5), %s766_s0, 4294965248  ;;  %s5724_s3 = sld [smem:[#allocation33_spill]]  ;;  %s5730_s22 = sshll.u32 %s4738_s17, 4 }
  0x8f   : > { %s5725_s6 = sld [smem:[#allocation51_spill]] }
  0x90   : > { %s5726_s21 = sld [smem:[#allocation54_spill]] }
  0x91   : > { %s5727_s0 = sld [smem:[#allocation56_spill]] }
  0x92   : > { %s5728_s9 = sld [smem:[#allocation57_spill]] }
  0x93   : > { %s5729_s27 = sld [smem:[#allocation58_spill]] }
  0x94   : > { %p861_p1 = scmp.lt.s32.totalorder %s5724_s3, 1  ;;  %p3317_p5 = scmp.ne.s32.totalorder %s5724_s3, 0 }
  0x96   : > { %s4794_s8 = scalar_select %p861_p1, %s5724_s3, 1 }
  0x97   : > { %881 = sbr.rel (%p3317_p5) target bundleno = 436 (0x1b4), region = 124 }
  0x98   : > { %s863_s12 = scalar_lea.vmem %s5725_s6, %s4794_s8  ;;  %s3316_s5 = sshll.u32 %s4794_s8, 1 }
  0x99   : > { %s4804_s25 = scalar_lea.vmem %s5726_s21, %s3316_s5  ;;  %s870_s30 = scalar_lea.vmem %s5727_s0, %s4794_s8 }
  0x9a   : > { %s873_s11 = scalar_lea.vmem %s5728_s9, %s4794_s8  ;;  %s876_s26 = scalar_lea.vmem %s5729_s27, %s4794_s8 }
  0x9b   : > { %s4820_s6 = scalar_lea.vmem [#allocation19], %s5730_s22 }
  0x9c   : > { %v882_v0 = vld [vmem:[%s4744_s10] sm:$0xff]  ;;  %v883_v3 = vld [vmem:[%s4744_s10 + $0x8] sm:$0xff]  ;;  %v4412_v8 = vmov 128.0  }
  0x9d   : > { %v886_v1 = vld [vmem:[#allocation7] sm:$0xff]  ;;  %v884_v2 = vmul.f32 11.313708, %v882_v0  ;;  %v885_v5 = vmul.f32 11.313708, %v883_v3  ;;  %v887_v6 = vld [vmem:[#allocation7 + $0x8] sm:$0xff]  ;;  %3840 = vrcp.f32 %v4412_v8 }
  0x9e   : > { %v3838_v37 = vld [vmem:[#allocation8] ss:$0 sm:$0xff]  ;;  %v3839_v40 = vld [vmem:[#allocation10] ss:$0 sm:$0xff] }
  0x9f   : > { %v888_v4 = vadd.f32 %v886_v1, %v884_v2  ;;  %v889_v7 = vadd.f32 %v887_v6, %v885_v5 }
  0xa1   : > { %892 = vadd.xlane.f32.xlu0 %v888_v4 }
  0xa3   : > { %v3841_v9 = vpop.eup %3840 }
  0xa4   : > { %v897_v10 = vmul.f32 128.0, %v3841_v9  ;;  %vm901_vm0 = vweird.f32 %v3841_v9 }
  0xa6   : > { %v898_v11 = vsub.f32 1.0, %v897_v10 }
  0xa8   : > { %v899_v12 = vmul.f32 %v3841_v9, %v898_v11 }
  0xa9   : > { %894 = vadd.xlane.f32.xlu0 %v889_v7 }
  0xaa   : > { %v900_v13 = vadd.f32 %v3841_v9, %v899_v12 }
  0xac   : > { %v902_v14 = vsel %vm901_vm0, %v3841_v9, %v900_v13 }
 0x114   : > { %v893_v15 = vpop.xlane.xlu0 %892 }
 0x115   : > { %v903_v16 = vmul.f32 %v902_v14, %v893_v15 }
 0x117   : > { %v905_v17 = vsub.f32 %v888_v4, %v903_v16 }
 0x119   : > { %v907_v18 = vmul.f32 %v905_v17, %v905_v17 }
 0x11b   : > { %909 = vadd.xlane.f32.xlu1 %v907_v18 }
 0x11c   : > { %v895_v19 = vpop.xlane.xlu0 %894 }
 0x11d   : > { %v904_v20 = vmul.f32 %v902_v14, %v895_v19 }
 0x11f   : > { %v906_v21 = vsub.f32 %v889_v7, %v904_v20 }
 0x121   : > { %v908_v22 = vmul.f32 %v906_v21, %v906_v21 }
 0x123   : > { %911 = vadd.xlane.f32.xlu1 %v908_v22 }
 0x18e   : > { %v910_v23 = vpop.xlane.xlu1 %909 }
 0x18f   : > { %v913_v24 = vmul.f32 %v910_v23, %v902_v14 }
 0x191   : > { %v915_v25 = vadd.f32 1e-06, %v913_v24 }
 0x193   : > { %3842 = vrsqrt.f32 %v915_v25  ;;  %vm923_vm2 = vweird.f32 %v915_v25 }
 0x196   : > { %v912_v26 = vpop.xlane.xlu1 %911 }
 0x197   : > { %v914_v27 = vmul.f32 %v912_v26, %v902_v14 }
 0x199   : > { %v3843_v28 = vpop.eup %3842  ;;  %v916_v29 = vadd.f32 1e-06, %v914_v27 }
 0x19a   : > { %v918_v30 = vmul.f32 %v3843_v28, %v915_v25  ;;  %vm924_vm1 = vweird.f32 %v3843_v28 }
 0x19b   : > { %3844 = vrsqrt.f32 %v916_v29  ;;  %vm925_vm3 = vmor %vm923_vm2, %vm924_vm1  ;;  %vm933_vm5 = vweird.f32 %v916_v29 }
 0x19c   : > { %v919_v31 = vmul.f32 %v3843_v28, %v918_v30 }
 0x19e   : > { %v920_v32 = vmul.f32 0.5, %v919_v31 }
 0x1a0   : > { %v921_v33 = vsub.f32 1.5, %v920_v32 }
 0x1a1   : > { %v3845_v34 = vpop.eup %3844 }
 0x1a2   : > { %v922_v35 = vmul.f32 %v3843_v28, %v921_v33  ;;  %v928_v36 = vmul.f32 %v3845_v34, %v916_v29  ;;  %vm934_vm4 = vweird.f32 %v3845_v34 }
 0x1a3   : > { %vm935_vm6 = vmor %vm933_vm5, %vm934_vm4 }
 0x1a4   : > { %v926_v38 = vsel %vm925_vm3, %v3843_v28, %v922_v35  ;;  %v929_v39 = vmul.f32 %v3845_v34, %v928_v36 }
 0x1a5   : > { %v937_v41 = vmul.f32 %v926_v38, %v905_v17 }
 0x1a6   : > { %v930_v42 = vmul.f32 0.5, %v929_v39 }
 0x1a7   : > { %v942_v43 = vmul.f32 %v3838_v37, %v937_v41 }
 0x1a8   : > { %v931_v44 = vsub.f32 1.5, %v930_v42 }
 0x1a9   : > { %v947_v45 = vadd.f32 %v3839_v40, %v942_v43 }
 0x1aa   : > { %v932_v46 = vmul.f32 %v3845_v34, %v931_v44 }
 0x1ab   : > { %949 = vst [vmem:[%s4820_s6] sm:$0xff] %v947_v45 }
 0x1ac   : > { %v936_v47 = vsel %vm935_vm6, %v3845_v34, %v932_v46 }
 0x1ad   : > { %v938_v48 = vmul.f32 %v936_v47, %v906_v21 }
 0x1af   : > { %v943_v49 = vmul.f32 %v3838_v37, %v938_v48 }
 0x1b1   : > { %v948_v50 = vadd.f32 %v3839_v40, %v943_v49 }
 0x1b3   : > { %950 = vst [vmem:[%s4820_s6 + $0x8] sm:$0xff] %v948_v50 }
 0x1b4 PF: > { %v3404_v51 = vld [vmem:[%s4768_s24 + $0xa8] sm:$0xf]  ;;  %v3613_v52 = vld [vmem:[%s4768_s24 + $0xb0] sm:$0xf0]  ;;  %v3612_v53 = vld [vmem:[%s4768_s24 + $0xac] sm:$0xf] }
 0x1b5   : > { %v3405_v54 = vor.u32 %v3613_v52, %v3404_v51  ;;  %v3406_v55 = vld [vmem:[%s4768_s24 + $0xb4] sm:$0xf0]  ;;  %v3392_v56 = vld [vmem:[%s4768_s24 + $0x90] sm:$0xf]  ;;  %v3610_v57 = vld [vmem:[%s4768_s24 + $0x98] sm:$0xf0] }
 0x1b6   : > { %v3409_v58 = vor.u32 %v3612_v53, %v3406_v55  ;;  %v3609_v59 = vld [vmem:[%s4768_s24 + $0x94] sm:$0xf]  ;;  %v3394_v60 = vld [vmem:[%s4768_s24 + $0x9c] sm:$0xf0]  ;;  %v3393_v61 = vor.u32 %v3610_v57, %v3392_v56  ;;  %v3380_v63 = vld [vmem:[%s4768_s24 + $0x78] sm:$0xf] }
 0x1b7   : > { %1134 = vmatpush.bf16.msra.mxu0 %v3405_v54  ;;  %v3397_v62 = vor.u32 %v3609_v59, %v3394_v60  ;;  %v3607_v0 = vld [vmem:[%s4768_s24 + $0x80] sm:$0xf0]  ;;  %v3606_v1 = vld [vmem:[%s4768_s24 + $0x7c] sm:$0xf]  ;;  %v3382_v2 = vld [vmem:[%s4768_s24 + $0x84] sm:$0xf0] }
 0x1b8   : > { %1148 = vmatpush.bf16.msra.mxu1 %v3409_v58  ;;  %v3381_v3 = vor.u32 %v3607_v0, %v3380_v63  ;;  %v3385_v4 = vor.u32 %v3606_v1, %v3382_v2  ;;  %v3368_v5 = vld [vmem:[%s4768_s24 + $0x60] sm:$0xf]  ;;  %v3604_v6 = vld [vmem:[%s4768_s24 + $0x68] sm:$0xf0]  ;;  %v3603_v7 = vld [vmem:[%s4768_s24 + $0x64] sm:$0xf] }
 0x1b9   : > { %v3370_v8 = vld [vmem:[%s4768_s24 + $0x6c] sm:$0xf0]  ;;  %v3356_v9 = vld [vmem:[%s4768_s24 + $0x48] sm:$0xf]  ;;  %v3369_v10 = vor.u32 %v3604_v6, %v3368_v5  ;;  %v3601_v11 = vld [vmem:[%s4768_s24 + $0x50] sm:$0xf0] }
 0x1ba   : > { %v3373_v12 = vor.u32 %v3603_v7, %v3370_v8  ;;  %v3600_v13 = vld [vmem:[%s4768_s24 + $0x4c] sm:$0xf]  ;;  %v3358_v14 = vld [vmem:[%s4768_s24 + $0x54] sm:$0xf0]  ;;  %v3357_v15 = vor.u32 %v3601_v11, %v3356_v9  ;;  %v3344_v17 = vld [vmem:[%s4768_s24 + $0x30] sm:$0xf] }
 0x1bb   : > { %1135 = vmatpush.bf16.msra.mxu0 %v3393_v61  ;;  %v3361_v16 = vor.u32 %v3600_v13, %v3358_v14  ;;  %v3598_v18 = vld [vmem:[%s4768_s24 + $0x38] sm:$0xf0]  ;;  %v3597_v19 = vld [vmem:[%s4768_s24 + $0x34] sm:$0xf]  ;;  %v3346_v20 = vld [vmem:[%s4768_s24 + $0x3c] sm:$0xf0] }
 0x1bc   : > { %1149 = vmatpush.bf16.msra.mxu1 %v3397_v62  ;;  %v3345_v21 = vor.u32 %v3598_v18, %v3344_v17  ;;  %v3349_v22 = vor.u32 %v3597_v19, %v3346_v20  ;;  %v3332_v23 = vld [vmem:[%s4768_s24 + $0x18] sm:$0xf]  ;;  %v3595_v24 = vld [vmem:[%s4768_s24 + $0x20] sm:$0xf0]  ;;  %v3594_v25 = vld [vmem:[%s4768_s24 + $0x1c] sm:$0xf] }
 0x1bd   : > { %v3334_v26 = vld [vmem:[%s4768_s24 + $0x24] sm:$0xf0]  ;;  %v3333_v27 = vor.u32 %v3595_v24, %v3332_v23  ;;  %v3320_v29 = vld [vmem:[%s4768_s24] sm:$0xf]  ;;  %v3592_v30 = vld [vmem:[%s4768_s24 + $0x8] sm:$0xf0] }
 0x1be   : > { %v3337_v28 = vor.u32 %v3594_v25, %v3334_v26  ;;  %v3591_v31 = vld [vmem:[%s4768_s24 + $0x4] sm:$0xf]  ;;  %v3322_v32 = vld [vmem:[%s4768_s24 + $0xc] sm:$0xf0]  ;;  %v3321_v33 = vor.u32 %v3592_v30, %v3320_v29  ;;  %s4413_s9 = smov 64   ;;  %s4414_s22 = smov 32  }
 0x1bf   : > { %1136 = vmatpush.bf16.msra.mxu0 %v3381_v3  ;;  %v951_v34 = vld [vmem:[%s4820_s6] sm:$0xff]  ;;  %v952_v35 = vld [vmem:[%s4820_s6 + $0x8] sm:$0xff]  ;;  %v3325_v36 = vor.u32 %v3591_v31, %v3322_v32  ;;  %s4415_s27 = smov 96   ;;  %v4416_v47 = vmov 1983009808   ;;  %vm1197_vm7 = vcmask 1047556  }
 0x1c0   : > { %1150 = vmatpush.bf16.msra.mxu1 %v3385_v4  ;;  %v4861_v37 = vpack.c.bf16 %v952_v35, %v951_v34  ;;  %v1202_v48 = vunpack.c.l.s4 %v4416_v47  ;;  %v4417_v2 = vmov 1934713408   ;;  %vm1931_vm8 = vcmask 261120   ;;  %s5731_s1 = scalar_lea.vmem [#allocation5], %s4738_s17  ;;  %s5740_s19 = sld [smem:[#allocation59_spill]] }
 0x1c1   : > { %v1226_v3 = vunpack.c.l.s4 %v4417_v2  ;;  %vm2053_vm11 = vcmask 130048   ;;  %vm2508_vm12 = vcmask 523264   ;;  %vm2511_vm13 = vcmask 785408   ;;  %s2988_s14 = scalar_lea.sflag [#allocation4], %s4738_s17 }
 0x1c2   : > { %v4877_v53 = vunpack.c.0.s8 %v1202_v48 }
 0x1c3   : > { %1137 = vmatpush.bf16.msra.mxu0 %v3369_v10  ;;  %v4909_v23 = vunpack.c.0.s8 %v1226_v3 }
 0x1c4   : > { %1151 = vmatpush.bf16.msra.mxu1 %v3373_v12 }
 0x1c6   : > { %s5741_s0 = smov %s5740_s19 }
 0x1c7   : > { %1138 = vmatpush.bf16.msra.mxu0 %v3357_v15  ;;  %s4275_s10 = scalar_lea.hbm %s5741_s0, 32 }
 0x1c8   : > { %1152 = vmatpush.bf16.msra.mxu1 %v3361_v16 }
 0x1cb   : > { %1139 = vmatpush.bf16.msra.mxu0 %v3345_v21 }
 0x1cc   : > { %1153 = vmatpush.bf16.msra.mxu1 %v3349_v22 }
 0x1cf   : > { %1140 = vmatpush.bf16.msra.mxu0 %v3333_v27 }
 0x1d0   : > { %1154 = vmatpush.bf16.msra.mxu1 %v3337_v28 }
 0x1d3   : > { %1141 = vmatpush.bf16.msra.mxu0 %v3321_v33 }
 0x1d4   : > { %1155 = vmatpush.bf16.msra.mxu1 %v3325_v36 }
 0x1d6   : > { %1142 = vmatmul.bf16.vlgmr.msra.gmra.mxu0 %v4861_v37 }
 0x1d7   : > { %1156 = vmatmul.bf16.vlgmr.msra.gmra.mxu1 %v4861_v37 }
 0x253   : > { %v1143_v38 = vpop.f32.mrf.mxu0 }
 0x254   : > { %v4865_v39 = vpop.f32.mrf.mxu1  ;;  %v1199_v51 = vrot.slane %v1143_v38, 4 }
 0x255   : > { %v1447_v20 = vrot.slane %v4865_v39, 4 }
 0x25b   : > { %v1145_v40 = vpop.f32.mrf.mxu0 }
 0x25c   : > { %v4867_v41 = vpop.f32.mrf.mxu1  ;;  %v3866_v42 = vpack.i.bf16 %v1145_v40, %v1143_v38  ;;  %v1255_v52 = vrot.slane %v1145_v40, 4 }
 0x25d   : > { %v3856_v43 = vpack.i.bf16 %v4867_v41, %v4865_v39  ;;  %v1503_v21 = vrot.slane %v4867_v41, 4 }
 0x25e   : > { %3867 = vrot.lane.b32.xlu2 %v3866_v42, %s4413_s9 }
 0x25f   : > { %3857 = vrot.lane.b32.xlu1 %v3856_v43, %s4414_s22  ;;  %3847 = vrot.lane.b32.xlu0 %v3856_v43, %s4415_s27 }
 0x266   : > { %3872 = vrot.lane.b32.xlu2 %v3866_v42, %s4414_s22 }
 0x267   : > { %3852 = vrot.lane.b32.xlu0 %v3856_v43, %s4413_s9  ;;  %3862 = vrot.lane.b32.xlu1 %v3866_v42, %s4415_s27 }
 0x2b8   : > { %v3868_v44 = vpop.permute.xlu2 %3867 }
 0x2b9   : > { %v3870_v45 = vunpack.i.h.bf16 %v3868_v44  ;;  %v3869_v46 = vunpack.i.l.bf16 %v3868_v44 }
 0x2bb   : > { %v1253_v49 = vrot.slane %v3870_v45, 4  ;;  %v1196_v50 = vrot.slane %v3869_v46, 4  ;;  %v1200_v54 = vsel %vm1197_vm7, %v3869_v46, %v1199_v51  ;;  %v1256_v57 = vsel %vm1197_vm7, %v3870_v45, %v1255_v52 }
 0x2bc   : > { %v4886_v1 = vperm.slane %v1200_v54, %v4877_v53  ;;  %v4895_v10 = vperm.slane %v1256_v57, %v4877_v53 }
 0x2bd   : > { %v1254_v55 = vsel %vm1197_vm7, %v1253_v49, %v1145_v40  ;;  %v1198_v56 = vsel %vm1197_vm7, %v1196_v50, %v1143_v38 }
 0x2be   : > { %v4889_v8 = vperm.slane %v1254_v55, %v4877_v53  ;;  %v4892_v9 = vperm.slane %v1198_v56, %v4877_v53  ;;  %v1235_v22 = vrot.slane %v4886_v1, 4  ;;  %v1291_v26 = vrot.slane %v4895_v10, 4 }
 0x2c0   : > { %v4883_v60 = vpop.permute.xlu2 %3872  ;;  %v1279_v24 = vrot.slane %v4889_v8, 4  ;;  %v1223_v25 = vrot.slane %v4892_v9, 4 }
 0x2c1   : > { %v3875_v11 = vunpack.i.h.bf16 %v4883_v60  ;;  %v3874_v16 = vunpack.i.l.bf16 %v4883_v60 }
 0x2c3   : > { %v1265_v30 = vrot.slane %v3875_v11, 4  ;;  %v1209_v34 = vrot.slane %v3874_v16, 4 }
 0x2d1   : > { %v3858_v58 = vpop.permute.xlu1 %3857  ;;  %v3848_v59 = vpop.permute.xlu0 %3847 }
 0x2d2   : > { %v3860_v61 = vunpack.i.h.bf16 %v3858_v58  ;;  %v3859_v62 = vunpack.i.l.bf16 %v3858_v58  ;;  %v3850_v63 = vunpack.i.h.bf16 %v3848_v59  ;;  %v3849_v0 = vunpack.i.l.bf16 %v3848_v59 }
 0x2d4   : > { %v1513_v4 = vrot.slane %v3860_v61, 4  ;;  %v1457_v5 = vrot.slane %v3859_v62, 4  ;;  %v1515_v6 = vrot.slane %v3850_v63, 4  ;;  %v1459_v7 = vrot.slane %v3849_v0, 4 }
 0x2d6   : > { %v1514_v12 = vsel %vm1197_vm7, %v1513_v4, %v3850_v63  ;;  %v1516_v13 = vsel %vm1197_vm7, %v3860_v61, %v1515_v6  ;;  %v1458_v14 = vsel %vm1197_vm7, %v1457_v5, %v3849_v0  ;;  %v1460_v15 = vsel %vm1197_vm7, %v3859_v62, %v1459_v7 }
 0x2d7   : > { %v1520_v17 = vperm.slane %v1514_v12, %v4877_v53  ;;  %v1524_v18 = vperm.slane %v1516_v13, %v4877_v53  ;;  %v1464_v19 = vperm.slane %v1458_v14, %v4877_v53  ;;  %v1468_v27 = vperm.slane %v1460_v15, %v4877_v53 }
 0x2d9   : > { %v3853_v28 = vpop.permute.xlu0 %3852  ;;  %v4915_v29 = vpop.permute.xlu1 %3862  ;;  %v1525_v35 = vrot.slane %v1520_v17, 4  ;;  %v1537_v36 = vrot.slane %v1524_v18, 4  ;;  %v1469_v38 = vrot.slane %v1464_v19, 4  ;;  %v1481_v45 = vrot.slane %v1468_v27, 4 }
 0x2da   : > { %v3855_v31 = vunpack.i.h.bf16 %v3853_v28  ;;  %v3854_v32 = vunpack.i.l.bf16 %v3853_v28  ;;  %v3865_v33 = vunpack.i.h.bf16 %v4915_v29  ;;  %v3864_v52 = vunpack.i.l.bf16 %v4915_v29 }
 0x2dc   : > { %v1501_v40 = vrot.slane %v3855_v31, 4  ;;  %v1445_v42 = vrot.slane %v3854_v32, 4  ;;  %v1448_v43 = vsel %vm1197_vm7, %v3854_v32, %v1447_v20  ;;  %v1504_v44 = vsel %vm1197_vm7, %v3855_v31, %v1503_v21 }
 0x2dd   : > { %v1456_v46 = vperm.slane %v1448_v43, %v4877_v53  ;;  %v1512_v47 = vperm.slane %v1504_v44, %v4877_v53  ;;  %v1266_v48 = vsel %vm1197_vm7, %v1265_v30, %v3865_v33  ;;  %v1267_v51 = vrot.slane %v3865_v33, 4 }
 0x2de   : > { %v1502_v49 = vsel %vm1197_vm7, %v1501_v40, %v4867_v41  ;;  %v1446_v50 = vsel %vm1197_vm7, %v1445_v42, %v4865_v39  ;;  %v1272_v41 = vperm.slane %v1266_v48, %v4877_v53  ;;  %v1210_v31 = vsel %vm1197_vm7, %v1209_v34, %v3864_v52 }
 0x2df   : > { %v1508_v54 = vperm.slane %v1502_v49, %v4877_v53  ;;  %v1452_v55 = vperm.slane %v1446_v50, %v4877_v53  ;;  %v1482_v56 = vsel %vm1197_vm7, %v1481_v45, %v1456_v46  ;;  %v1483_v57 = vrot.slane %v1456_v46, 4 }
 0x2e0   : > { %v1488_v58 = vperm.slane %v1482_v56, %v4909_v23  ;;  %v1538_v59 = vsel %vm1197_vm7, %v1537_v36, %v1512_v47  ;;  %v1539_v61 = vrot.slane %v1512_v47, 4  ;;  %v1268_v21 = vsel %vm1197_vm7, %v3875_v11, %v1267_v51 }
 0x2e1   : > { %v1527_v62 = vrot.slane %v1508_v54, 4  ;;  %v1470_v39 = vsel %vm1197_vm7, %v1469_v38, %v1452_v55  ;;  %v1471_v63 = vrot.slane %v1452_v55, 4  ;;  %v1484_v0 = vsel %vm1197_vm7, %v1468_v27, %v1483_v57 }
 0x2e2   : > { %v1476_v2 = vperm.slane %v1470_v39, %v4909_v23  ;;  %v1492_v3 = vperm.slane %v1484_v0, %v4909_v23  ;;  %v1497_v4 = vrot.slane %v1488_v58, 4  ;;  %v1526_v5 = vsel %vm1197_vm7, %v1525_v35, %v1508_v54 }
 0x2e3   : > { %v1472_v6 = vsel %vm1197_vm7, %v1464_v19, %v1471_v63  ;;  %v1528_v7 = vsel %vm1197_vm7, %v1520_v17, %v1527_v62  ;;  %v4946_v12 = vperm.slane %v1526_v5, %v4909_v23  ;;  %v1540_v13 = vsel %vm1197_vm7, %v1524_v18, %v1539_v61 }
 0x2e4   : > { %v1480_v14 = vperm.slane %v1472_v6, %v4909_v23  ;;  %v1493_v15 = vrot.slane %v1476_v2, 4  ;;  %v1499_v20 = vrot.slane %v1492_v3, 4  ;;  %v1536_v27 = vperm.slane %v1528_v7, %v4909_v23 }
 0x2e5   : > { %v1544_v28 = vperm.slane %v1538_v59, %v4909_v23  ;;  %v1548_v19 = vperm.slane %v1540_v13, %v4909_v23  ;;  %v1549_v17 = vrot.slane %v4946_v12, 4  ;;  %v1498_v30 = vsel %vm1197_vm7, 0.0, %v1497_v4 }
 0x2e6   : > { %v1495_v29 = vrot.slane %v1480_v14, 4  ;;  %v1500_v18 = vsel %vm1197_vm7, 0.0, %v1499_v20  ;;  %v1494_v32 = vsel %vm1197_vm7, 0.0, %v1493_v15  ;;  %v4961_v33 = vrot.slane %v1536_v27, 4 }
 0x2e7   : > { %v1553_v11 = vrot.slane %v1544_v28, 4  ;;  %v1555_v35 = vrot.slane %v1548_v19, 4  ;;  %v1573_v38 = vrot.slane %v1500_v18, 4  ;;  %v1276_v40 = vperm.slane %v1268_v21, %v4877_v53 }
 0x2e8   : > { %v1496_v36 = vsel %vm1197_vm7, 0.0, %v1495_v29  ;;  %v1277_v42 = vrot.slane %v1272_v41, 4  ;;  %v4966_v43 = vsel %vm1197_vm7, 0.0, %v1549_v17  ;;  %v4970_v44 = vsel %vm1197_vm7, 0.0, %v4961_v33 }
 0x2e9   : > { %v1556_v34 = vsel %vm1197_vm7, 0.0, %v1555_v35  ;;  %v1568_v45 = vsel %vm1197_vm7, %v1499_v20, %v1488_v58  ;;  %v1554_v46 = vsel %vm1197_vm7, 0.0, %v1553_v11  ;;  %v1562_v47 = vrot.slane %v1496_v36, 4 }
 0x2ea   : > { %v1574_v48 = vsel %vm1197_vm7, %v1573_v38, %v1498_v30  ;;  %v1616_v49 = vrot.slane %v4970_v44, 4  ;;  %v1278_v50 = vsel %vm1197_vm7, %v1277_v42, %v4889_v8  ;;  %v1280_v51 = vsel %vm1197_vm7, %v1272_v41, %v1279_v24 }
 0x2eb   : > { %v1289_v54 = vrot.slane %v1276_v40, 4  ;;  %v1211_v55 = vrot.slane %v3864_v52, 4  ;;  %v1627_v56 = vrot.slane %v1556_v34, 4  ;;  %v4983_v57 = vperm.slane %v1278_v50, %v4909_v23 }
 0x2ec   : > { %v1288_v58 = vperm.slane %v1280_v51, %v4909_v23  ;;  %v1216_v59 = vperm.slane %v1210_v31, %v4877_v53  ;;  %v1292_v8 = vsel %vm1197_vm7, %v1276_v40, %v1291_v26  ;;  %v1557_v24 = vsel %vm1197_vm7, %v1495_v29, %v1476_v2 }
 0x2ed   : > { %v1212_v61 = vsel %vm1197_vm7, %v3874_v16, %v1211_v55  ;;  %v1290_v62 = vsel %vm1197_vm7, %v1289_v54, %v4895_v10  ;;  %v1622_v52 = vsel %vm1197_vm7, %v1555_v35, %v1544_v28  ;;  %v1301_v60 = vrot.slane %v4983_v57, 4 }
 0x2ee   : > { %v4997_v41 = vrot.slane %v1288_v58, 4  ;;  %v1220_v39 = vperm.slane %v1212_v61, %v4877_v53  ;;  %v1221_v63 = vrot.slane %v1216_v59, 4  ;;  %v1224_v16 = vsel %vm1197_vm7, %v1216_v59, %v1223_v25 }
 0x2ef   : > { %v5005_v0 = vperm.slane %v1290_v62, %v4909_v23  ;;  %v1300_v10 = vperm.slane %v1292_v8, %v4909_v23  ;;  %v1628_v26 = vsel %vm1197_vm7, %v1627_v56, %v1554_v46  ;;  %v1232_v3 = vperm.slane %v1224_v16, %v4909_v23 }
 0x2f0   : > { %v1222_v2 = vsel %vm1197_vm7, %v1221_v63, %v4892_v9  ;;  %v1561_v4 = vperm.slane %v1557_v24, %v4877_v53  ;;  %v5015_v5 = vsel %vm1197_vm7, 0.0, %v4997_v41  ;;  %v1233_v6 = vrot.slane %v1220_v39, 4 }
 0x2f1   : > { %v5018_v25 = vperm.slane %v1222_v2, %v4909_v23  ;;  %v1236_v7 = vsel %vm1197_vm7, %v1220_v39, %v1235_v22  ;;  %v5024_v14 = vrot.slane %v1232_v3, 4  ;;  %v1305_v9 = vrot.slane %v5005_v0, 4 }
 0x2f2   : > { %v1244_v13 = vperm.slane %v1236_v7, %v4909_v23  ;;  %v5027_v15 = vrot.slane %v1300_v10, 4  ;;  %v5030_v20 = vsel %vm1197_vm7, 0.0, %v1301_v60  ;;  %v1234_v21 = vsel %vm1197_vm7, %v1233_v6, %v4886_v1 }
 0x2f3   : > { %v1245_v27 = vrot.slane %v5018_v25, 4  ;;  %v1563_v28 = vsel %vm1197_vm7, %v1562_v47, %v1494_v32  ;;  %v1368_v22 = vrot.slane %v5015_v5, 4  ;;  %v5038_v19 = vperm.slane %v1234_v21, %v4909_v23 }
 0x2f4   : > { %v5042_v17 = vsel %vm1197_vm7, 0.0, %v5024_v14  ;;  %v5044_v29 = vrot.slane %v1244_v13, 4  ;;  %v5047_v30 = vsel %vm1197_vm7, 0.0, %v1305_v9  ;;  %v5051_v1 = vsel %vm1197_vm7, 0.0, %v5027_v15 }
 0x2f5   : > { %v1567_v18 = vperm.slane %v1563_v28, %v4877_v53  ;;  %v1572_v31 = vperm.slane %v1568_v45, %v4877_v53  ;;  %v1246_v32 = vsel %vm1197_vm7, 0.0, %v1245_v27  ;;  %v1249_v11 = vrot.slane %v5038_v19, 4 }
 0x2f6   : > { %v1314_v35 = vrot.slane %v5042_v17, 4  ;;  %v1578_v36 = vperm.slane %v1574_v48, %v4877_v53  ;;  %v5061_v38 = vsel %vm1197_vm7, 0.0, %v5044_v29  ;;  %v1581_v42 = vrot.slane %v1561_v4, 4 }
 0x2f7   : > { %v1579_v40 = vrot.slane %v1567_v18, 4  ;;  %v1611_v44 = vsel %vm1197_vm7, %v4961_v33, %v4946_v12  ;;  %v1379_v34 = vrot.slane %v5051_v1, 4  ;;  %v1617_v47 = vsel %vm1197_vm7, %v1616_v49, %v4966_v43 }
 0x2f8   : > { %v1591_v45 = vrot.slane %v1578_v36, 4  ;;  %v1615_v46 = vperm.slane %v1611_v44, %v4877_v53  ;;  %v1621_v50 = vperm.slane %v1617_v47, %v4877_v53  ;;  %v1626_v51 = vperm.slane %v1622_v52, %v4877_v53 }
 0x2f9   : > { %v1580_v48 = vsel %vm1197_vm7, %v1579_v40, %v1561_v4  ;;  %v1632_v54 = vperm.slane %v1628_v26, %v4877_v53  ;;  %v1325_v55 = vrot.slane %v5061_v38, 4  ;;  %v1582_v43 = vsel %vm1197_vm7, %v1567_v18, %v1581_v42 }
 0x2fa   : > { %v1586_v12 = vperm.slane %v1580_v48, %v4909_v23  ;;  %v1592_v33 = vsel %vm1197_vm7, %v1591_v45, %v1572_v31  ;;  %v1635_v56 = vrot.slane %v1615_v46, 4  ;;  %v1633_v59 = vrot.slane %v1621_v50, 4 }
 0x2fb   : > { %v1598_v58 = vperm.slane %v1592_v33, %v4909_v23  ;;  %v1645_v61 = vrot.slane %v1632_v54, 4  ;;  %v5080_v49 = vperm.slane %v1582_v43, %v4909_v23  ;;  %v1593_v62 = vrot.slane %v1572_v31, 4 }
 0x2fc   : > { %v1636_v8 = vsel %vm1197_vm7, %v1621_v50, %v1635_v56  ;;  %v1647_v24 = vrot.slane %v1626_v51, 4  ;;  %v1634_v39 = vsel %vm1197_vm7, %v1633_v59, %v1615_v46  ;;  %v1605_v27 = vrot.slane %v1586_v12, 4 }
 0x2fd   : > { %v1603_v52 = vrot.slane %v1598_v58, 4  ;;  %v1646_v63 = vsel %vm1197_vm7, %v1645_v61, %v1626_v51  ;;  %v5086_v60 = vperm.slane %v1636_v8, %v4909_v23  ;;  %v1640_v16 = vperm.slane %v1634_v39, %v4909_v23 }
 0x2fe   : > { %v1652_v10 = vperm.slane %v1646_v63, %v4909_v23  ;;  %v1594_v26 = vsel %vm1197_vm7, %v1578_v36, %v1593_v62  ;;  %v1609_v2 = vrot.slane %v5080_v49, 4  ;;  %v1648_v6 = vsel %vm1197_vm7, %v1632_v54, %v1647_v24 }
 0x2ff   : > { %v1604_v3 = vsel %vm1197_vm7, %v1603_v52, %v1586_v12  ;;  %v5094_v4 = vperm.slane %v1594_v26, %v4909_v23  ;;  %v1663_v7 = vrot.slane %v5086_v60, 4  ;;  %v5099_v21 = vperm.slane %v1648_v6, %v4909_v23 }
 0x300   : > { %v1657_v13 = vrot.slane %v1652_v10, 4  ;;  %v1665_v9 = vpack.c.bf16 %v1604_v3, %v1604_v3  ;;  %v1250_v28 = vsel %vm1197_vm7, 0.0, %v1249_v11  ;;  %v1659_v18 = vrot.slane %v1640_v16, 4 }
 0x301   : > { %v1610_v17 = vsel %vm1197_vm7, %v5094_v4, %v1609_v2  ;;  %v1309_v31 = vsel %vm1197_vm7, %v5024_v14, %v5018_v25  ;;  %v1664_v40 = vsel %vm1197_vm7, %v5099_v21, %v1663_v7  ;;  %v1606_v11 = vsel %vm1197_vm7, %v1598_v58, %v1605_v27 }
 0x302   : > { %v1658_v36 = vsel %vm1197_vm7, %v1657_v13, %v1640_v16  ;;  %v1928_v38 = vunpack.c.l.b16 %v1665_v9  ;;  %v1671_v44 = vpack.c.bf16 %v1610_v17, %v1610_v17  ;;  %v1672_v45 = vpack.c.bf16 %v1664_v40, %v1664_v40 }
 0x303   : > { %v1666_v42 = vpack.c.bf16 %v1658_v36, %v1658_v36  ;;  %v1660_v46 = vsel %vm1197_vm7, %v1652_v10, %v1659_v18  ;;  %v1667_v47 = vpack.c.bf16 %v1606_v11, %v1606_v11  ;;  %v1313_v48 = vperm.slane %v1309_v31, %v4877_v53 }
 0x304   : > { %v1315_v50 = vsel %vm1197_vm7, %v1314_v35, %v1246_v32  ;;  %v2019_v14 = vunpack.c.l.b16 %v1671_v44  ;;  %v2020_v51 = vunpack.c.l.b16 %v1672_v45  ;;  %v1668_v54 = vpack.c.bf16 %v1660_v46, %v1660_v46  ;;  %v3412_v46 = vld [vmem:[%s4768_s24 + $0xb0] sm:$0xf] }
 0x305   : > { %v1929_v25 = vunpack.c.l.b16 %v1666_v42  ;;  %v1607_v12 = vrot.slane %v5094_v4, 4  ;;  %v1959_v33 = vunpack.c.l.b16 %v1667_v47  ;;  %v1319_v56 = vperm.slane %v1315_v50, %v4877_v53  ;;  %v3614_v47 = vld [vmem:[%s4768_s24 + $0xb8] sm:$0xf0] }
 0x306   : > { %v1326_v59 = vsel %vm1197_vm7, %v1325_v55, %v1250_v28  ;;  %v2021_v58 = vpack.c.b16 %v2020_v51, %v2019_v14  ;;  %v1960_v43 = vunpack.c.l.b16 %v1668_v54  ;;  %v1320_v62 = vsel %vm1197_vm7, %v5044_v29, %v5038_v19 }
 0x307   : > { %v1930_v61 = vpack.c.b16 %v1929_v25, %v1928_v38  ;;  %v1330_v32 = vperm.slane %v1326_v59, %v4877_v53  ;;  %v1331_v35 = vrot.slane %v1319_v56, 4  ;;  %v1333_v8 = vrot.slane %v1313_v48, 4 }
 0x308   : > { %v1363_v24 = vsel %vm1197_vm7, %v4997_v41, %v4983_v57  ;;  %v2026_v39 = vsel %vm1931_vm8, %v2021_v58, 0  ;;  %v1961_v55 = vpack.c.b16 %v1960_v43, %v1959_v33  ;;  %v1324_v16 = vperm.slane %v1320_v62, %v4877_v53  ;;  %v3400_v33 = vld [vmem:[%s4768_s24 + $0x98] sm:$0xf] }
 0x309   : > { %v1936_v52 = vsel %vm1931_vm8, %v1930_v61, 0  ;;  %v1367_v63 = vperm.slane %v1363_v24, %v4877_v53  ;;  %2035 = vmatpush.bf16.xpose.msrb.mxu0 %v2026_v39  ;;  %v1343_v19 = vrot.slane %v1330_v32, 4  ;;  %v1369_v29 = vsel %vm1197_vm7, %v1368_v22, %v5030_v20 }
 0x30a   : > { %1945 = vmatpush.bf16.xpose.msra.mxu3 %v1936_v52  ;;  %v1374_v57 = vsel %vm1197_vm7, %v5027_v15, %v5005_v0  ;;  %v1966_v41 = vsel %vm1931_vm8, %v1961_v55, 0  ;;  %v1332_v10 = vsel %vm1197_vm7, %v1331_v35, %v1313_v48  ;;  %v1373_v26 = vperm.slane %v1369_v29, %v4877_v53  ;;  %v3388_v55 = vld [vmem:[%s4768_s24 + $0x80] sm:$0xf] }
 0x30b   : > { %v1378_v2 = vperm.slane %v1374_v57, %v4877_v53  ;;  %v1344_v3 = vsel %vm1197_vm7, %v1343_v19, %v1324_v16  ;;  %v1380_v5 = vsel %vm1197_vm7, %v1379_v34, %v5047_v30  ;;  %v1387_v20 = vrot.slane %v1367_v63, 4 }
 0x30c   : > { %v1334_v22 = vsel %vm1197_vm7, %v1319_v56, %v1333_v8  ;;  %v1661_v0 = vrot.slane %v5099_v21, 4  ;;  %v5147_v15 = vperm.slane %v1344_v3, %v4909_v23  ;;  %v1384_v4 = vperm.slane %v1380_v5, %v4877_v53  ;;  %v3611_v56 = vld [vmem:[%s4768_s24 + $0xa0] sm:$0xf0] }
 0x30d   : > { %v1385_v6 = vrot.slane %v1373_v26, 4  ;;  %v5151_v7 = vperm.slane %v1334_v22, %v4909_v23  ;;  %v1345_v13 = vrot.slane %v1324_v16, 4  ;;  %v1388_v9 = vsel %vm1197_vm7, %v1373_v26, %v1387_v20  ;;  %v3376_v26 = vld [vmem:[%s4768_s24 + $0x68] sm:$0xf] }
 0x30e   : > { %v1399_v1 = vrot.slane %v1378_v2, 4  ;;  %v1338_v30 = vperm.slane %v1332_v10, %v4909_v23  ;;  %v1355_v34 = vrot.slane %v5147_v15, 4  ;;  %v1397_v21 = vrot.slane %v1384_v4, 4 }
 0x30f   : > { %v5157_v27 = vperm.slane %v1388_v9, %v4909_v23  ;;  %v1386_v28 = vsel %vm1197_vm7, %v1385_v6, %v1367_v63  ;;  %v1346_v17 = vsel %vm1197_vm7, %v1330_v32, %v1345_v13  ;;  %v1361_v18 = vrot.slane %v5151_v7, 4  ;;  %v3608_v63 = vld [vmem:[%s4768_s24 + $0x88] sm:$0xf0] }
 0x310   : > { %v1400_v31 = vsel %vm1197_vm7, %v1384_v4, %v1399_v1  ;;  %v1356_v36 = vsel %vm1197_vm7, %v1355_v34, %v1338_v30  ;;  %v1398_v38 = vsel %vm1197_vm7, %v1397_v21, %v1378_v2  ;;  %v5166_v40 = vperm.slane %v1346_v17, %v4909_v23  ;;  %v3605_v2 = vld [vmem:[%s4768_s24 + $0x70] sm:$0xf0]  ;;  %v3602_v4 = vld [vmem:[%s4768_s24 + $0x58] sm:$0xf0]  ;;  %v3352_v1 = vld [vmem:[%s4768_s24 + $0x38] sm:$0xf] }
 0x311   : > { %v5169_v42 = vperm.slane %v1400_v31, %v4909_v23  ;;  %v1404_v44 = vperm.slane %v1398_v38, %v4909_v23  ;;  %v1417_v45 = vpack.c.bf16 %v1356_v36, %v1356_v36  ;;  %v1415_v11 = vrot.slane %v5157_v27, 4  ;;  %v3340_v17 = vld [vmem:[%s4768_s24 + $0x20] sm:$0xf] }
 0x312   : > { %1975 = vmatpush.bf16.xpose.msrb.mxu3 %v1966_v41  ;;  %v1362_v48 = vsel %vm1197_vm7, %v5166_v40, %v1361_v18  ;;  %v1608_v50 = vsel %vm1197_vm7, %v1607_v12, %v5080_v49  ;;  %v1392_v25 = vperm.slane %v1386_v28, %v4909_v23  ;;  %v1662_v61 = vsel %vm1197_vm7, %v1661_v0, %v5086_v60  ;;  %v3364_v0 = vld [vmem:[%s4768_s24 + $0x50] sm:$0xf]  ;;  %v3596_v18 = vld [vmem:[%s4768_s24 + $0x28] sm:$0xf0] }
 0x313   : > { %v1409_v14 = vrot.slane %v1404_v44, 4  ;;  %v1416_v51 = vsel %vm1197_vm7, %v5169_v42, %v1415_v11  ;;  %v1423_v54 = vpack.c.bf16 %v1362_v48, %v1362_v48  ;;  %v1669_v58 = vpack.c.bf16 %v1608_v50, %v1608_v50 }
 0x314   : > { %v1424_v59 = vpack.c.bf16 %v1416_v51, %v1416_v51  ;;  %v3413_v43 = vor.u32 %v3614_v47, %v3412_v46  ;;  %v1923_v49 = vunpack.c.l.b16 %v1417_v45  ;;  %v1670_v32 = vpack.c.bf16 %v1662_v61, %v1662_v61  ;;  %v3593_v45 = vld [vmem:[%s4768_s24 + $0x10] sm:$0xf0] }
 0x315   : > { %v1410_v62 = vsel %vm1197_vm7, %v1409_v14, %v1392_v25  ;;  %v2014_v12 = vunpack.c.l.b16 %v1423_v54  ;;  %v1989_v24 = vunpack.c.l.b16 %v1669_v58  ;;  %v3401_v52 = vor.u32 %v3611_v56, %v3400_v33  ;;  %v953_v14 = vld [vmem:[%s5731_s1] sm:$0x1] }
 0x316   : > { %v1418_v35 = vpack.c.bf16 %v1410_v62, %v1410_v62  ;;  %v2015_v8 = vunpack.c.l.b16 %v1424_v59  ;;  %1162 = vmatpush.bf16.msra.mxu2 %v3413_v43  ;;  %v1990_v39 = vunpack.c.l.b16 %v1670_v32  ;;  %v3389_v57 = vor.u32 %v3608_v63, %v3388_v55 }
 0x317   : > { %v1357_v41 = vrot.slane %v1338_v30, 4  ;;  %v1411_v10 = vrot.slane %v1392_v25, 4  ;;  %v3377_v5 = vor.u32 %v3605_v2, %v3376_v26  ;;  %v3365_v9 = vor.u32 %v3602_v4, %v3364_v0  ;;  %v3599_v30 = vld [vmem:[%s4768_s24 + $0x40] sm:$0xf0] }
 0x318   : > { %v1924_v16 = vunpack.c.l.b16 %v1418_v35  ;;  %v2016_v19 = vpack.c.b16 %v2015_v8, %v2014_v12  ;;  %v1991_v60 = vpack.c.b16 %v1990_v39, %v1989_v24  ;;  %v3353_v28 = vor.u32 %v3599_v30, %v3352_v1 }
 0x319   : > { %v1358_v20 = vsel %vm1197_vm7, %v5147_v15, %v1357_v41  ;;  %v1412_v22 = vsel %vm1197_vm7, %v1404_v44, %v1411_v10  ;;  %v3341_v15 = vor.u32 %v3596_v18, %v3340_v17  ;;  %v1359_v36 = vrot.slane %v5166_v40, 4  ;;  %v3328_v44 = vld [vmem:[%s4768_s24 + $0x8] sm:$0xf] }
 0x31a   : > { %v1925_v29 = vpack.c.b16 %v1924_v16, %v1923_v49  ;;  %3417 = vmatmul.msk.bf16.vlgmr.msrb.gmra.mxu0 %vm1931_vm8, %v2016_v19  ;;  %1163 = vmatpush.bf16.msra.mxu2 %v3401_v52  ;;  %v1996_v3 = vsel %vm1931_vm8, %v1991_v60, 0  ;;  %v1419_v6 = vpack.c.bf16 %v1358_v20, %v1358_v20  ;;  %v1420_v13 = vpack.c.bf16 %v1412_v22, %v1412_v22 }
 0x31b   : > { %v1413_v38 = vrot.slane %v5169_v42, 4  ;;  %v3329_v11 = vor.u32 %v3593_v45, %v3328_v44  ;;  %v1360_v46 = vsel %vm1197_vm7, %v1359_v36, %v5151_v7  ;;  %vm954_vm9 = vcmp.ne.s32.totalorder %v953_v14, 0 }
 0x31c   : > { %3414 = vmatmul.msk.bf16.vlgmr.msra.gmra.mxu3 %vm1931_vm8, %v1925_v29  ;;  %v1954_v34 = vunpack.c.l.b16 %v1419_v6  ;;  %v1955_v21 = vunpack.c.l.b16 %v1420_v13  ;;  %v1421_v48 = vpack.c.bf16 %v1360_v46, %v1360_v46  ;;  %v4418_v51 = vmov 0  }
 0x31d   : > { %2005 = vmatpush.bf16.xpose.msra.mxu3 %v1996_v3  ;;  %v1414_v47 = vsel %vm1197_vm7, %v1413_v38, %v5157_v27  ;;  %v2042_v54 = vsel %vm954_vm9, 1, %v4418_v51 }
 0x31e   : > { %1164 = vmatpush.bf16.msra.mxu2 %v3389_v57  ;;  %v1956_v31 = vpack.c.b16 %v1955_v21, %v1954_v34  ;;  %v1422_v50 = vpack.c.bf16 %v1414_v47, %v1414_v47  ;;  %v1984_v40 = vunpack.c.l.b16 %v1421_v48  ;;  %v2043_v33 = vperm.slane %v2042_v54, 0 }
 0x320   : > { %v1985_v42 = vunpack.c.l.b16 %v1422_v50  ;;  %vm5216_vm10 = vcmp.eq.s32.totalorder %v2043_v33, 1 }
 0x322   : > { %1165 = vmatpush.bf16.msra.mxu2 %v3377_v5  ;;  %v1986_v25 = vpack.c.b16 %v1985_v42, %v1984_v40 }
 0x326   : > { %1166 = vmatpush.bf16.msra.mxu2 %v3365_v9 }
 0x32a   : > { %1167 = vmatpush.bf16.msra.mxu2 %v3353_v28 }
 0x32c   : > { %3415 = vmatmul.msk.bf16.vlgmr.msrb.gmra.mxu3 %vm1931_vm8, %v1956_v31 }
 0x32e   : > { %1168 = vmatpush.bf16.msra.mxu2 %v3341_v15 }
 0x332   : > { %1169 = vmatpush.bf16.msra.mxu2 %v3329_v11 }
 0x335   : > { %1170 = vmatmul.bf16.vlgmr.msra.gmra.mxu2 %v4861_v37 }
 0x33c   : > { %3416 = vmatmul.msk.bf16.vlgmr.msra.gmra.mxu3 %vm1931_vm8, %v1986_v25 }
 0x397   : > { %v2037_v27 = vpop.f32.mrf.mxu0 }
 0x398   : > { %v5222_v37 = vsel %vm5216_vm10, %v2037_v27, -1e+09 }
 0x399   : > { %v2072_v56 = vsel %vm2053_vm11, %v5222_v37, -inf }
 0x39a   : > { %2073 = vmax.xlane.f32.xlu2 %v2072_v56 }
 0x39f   : > { %v1947_v59 = vpop.f32.mrf.mxu3  ;;  %v2039_v43 = vpop.f32.mrf.mxu0 }
 0x3a0   : > { %v2045_v61 = vsel %vm5216_vm10, %v1947_v59, -1e+09  ;;  %v2052_v62 = vsel %vm5216_vm10, %v2039_v43, -1e+09 }
 0x3a1   : > { %v2054_v58 = vsel %vm2053_vm11, %v2045_v61, -inf  ;;  %v2075_v32 = vsel %vm2053_vm11, %v2052_v62, -inf }
 0x3a2   : > { %2055 = vmax.xlane.f32.xlu0 %v2054_v58 }
 0x3a7   : > { %v1949_v49 = vpop.f32.mrf.mxu3 }
 0x3a8   : > { %v2046_v12 = vsel %vm5216_vm10, %v1949_v49, -1e+09 }
 0x3a9   : > { %v2057_v35 = vsel %vm2053_vm11, %v2046_v12, -inf }
 0x3aa   : > { %2076 = vmax.xlane.f32.xlu0 %v2075_v32  ;;  %2058 = vmax.xlane.f32.xlu1 %v2057_v35 }
 0x3af   : > { %v1977_v8 = vpop.f32.mrf.mxu3 }
 0x3b0   : > { %v2047_v24 = vsel %vm5216_vm10, %v1977_v8, -1e+09 }
 0x3b1   : > { %v2060_v52 = vsel %vm2053_vm11, %v2047_v24, -inf }
 0x3b2   : > { %2061 = vmax.xlane.f32.xlu0 %v2060_v52 }
 0x3b7   : > { %v1979_v39 = vpop.f32.mrf.mxu3 }
 0x3b8   : > { %v2048_v55 = vsel %vm5216_vm10, %v1979_v39, -1e+09  ;;  %v5240_v63 = vpop.f32.mrf.mxu2 }
 0x3b9   : > { %v2063_v16 = vsel %vm2053_vm11, %v2048_v55, -inf  ;;  %v1695_v35 = vrot.slane %v5240_v63, 4 }
 0x3ba   : > { %2064 = vmax.xlane.f32.xlu1 %v2063_v16 }
 0x3bf   : > { %v2007_v19 = vpop.f32.mrf.mxu3 }
 0x3c0   : > { %v2049_v60 = vsel %vm5216_vm10, %v2007_v19, -1e+09  ;;  %v5245_v29 = vpop.f32.mrf.mxu2 }
 0x3c1   : > { %v2066_v57 = vsel %vm2053_vm11, %v2049_v60, -inf  ;;  %v3886_v41 = vpack.i.bf16 %v5245_v29, %v5240_v63  ;;  %v1751_v8 = vrot.slane %v5245_v29, 4 }
 0x3c2   : > { %2067 = vmax.xlane.f32.xlu2 %v2066_v57 }
 0x3c6   : > { %3887 = vrot.lane.b32.xlu0 %v3886_v41, %s4414_s22 }
 0x3c7   : > { %v2009_v10 = vpop.f32.mrf.mxu3 }
 0x3c8   : > { %v2050_v26 = vsel %vm5216_vm10, %v2009_v10, -1e+09 }
 0x3c9   : > { %v2069_v2 = vsel %vm2053_vm11, %v2050_v26, -inf }
 0x3ca   : > { %2070 = vmax.xlane.f32.xlu2 %v2069_v2 }
 0x3d3   : > { %3877 = vrot.lane.b32.xlu1 %v3886_v41, %s4415_s27 }
 0x3e2   : > { %3882 = vrot.lane.b32.xlu2 %v3886_v41, %s4413_s9 }
 0x40d   : > { %v2074_v18 = vpop.xlane.xlu2 %2073 }
 0x40e   : > { %v2084_v14 = vsub.f32 %v5222_v37, %v2074_v18 }
 0x410   : > { %v2098_v56 = vmul.f32 1.442695, %v2084_v14 }
 0x415   : > { %v2056_v3 = vpop.xlane.xlu0 %2055 }
 0x416   : > { %v2078_v5 = vsub.f32 %v2045_v61, %v2056_v3 }
 0x418   : > { %v2086_v20 = vmul.f32 1.442695, %v2078_v5 }
 0x41a   : > { %3911 = vpow2.f32 %v2086_v20 }
 0x41d   : > { %v2077_v22 = vpop.xlane.xlu0 %2076  ;;  %v2059_v0 = vpop.xlane.xlu1 %2058 }
 0x41e   : > { %v2079_v4 = vsub.f32 %v2046_v12, %v2059_v0  ;;  %v2085_v28 = vsub.f32 %v2052_v62, %v2077_v22 }
 0x420   : > { %v5256_v6 = vpop.eup %3911  ;;  %v2088_v13 = vmul.f32 1.442695, %v2079_v4  ;;  %v2100_v31 = vmul.f32 1.442695, %v2085_v28 }
 0x421   : > { %v2102_v9 = vsel %vm2053_vm11, %v5256_v6, 0.0 }
 0x422   : > { %2103 = vadd.xlane.f32.xlu1 %v2102_v9  ;;  %3913 = vpow2.f32 %v2088_v13 }
 0x425   : > { %v2062_v1 = vpop.xlane.xlu0 %2061 }
 0x426   : > { %v2080_v30 = vsub.f32 %v2047_v24, %v2062_v1 }
 0x428   : > { %v2090_v34 = vmul.f32 1.442695, %v2080_v30  ;;  %v5260_v21 = vpop.eup %3913 }
 0x429   : > { %v2105_v17 = vsel %vm2053_vm11, %v5260_v21, 0.0 }
 0x42a   : > { %3915 = vpow2.f32 %v2090_v34  ;;  %2106 = vadd.xlane.f32.xlu0 %v2105_v17 }
 0x42b   : > { %3917 = vpow2.f32 %v2100_v31 }
 0x42d   : > { %v2065_v38 = vpop.xlane.xlu1 %2064 }
 0x42e   : > { %v2081_v45 = vsub.f32 %v2048_v55, %v2065_v38 }
 0x430   : > { %v5264_v15 = vpop.eup %3915  ;;  %v2092_v48 = vmul.f32 1.442695, %v2081_v45 }
 0x431   : > { %v2108_v36 = vsel %vm2053_vm11, %v5264_v15, 0.0  ;;  %v5268_v46 = vpop.eup %3917 }
 0x432   : > { %2109 = vadd.xlane.f32.xlu0 %v2108_v36  ;;  %v2123_v50 = vsel %vm2053_vm11, %v5268_v46, 0.0 }
 0x435   : > { %v2068_v44 = vpop.xlane.xlu2 %2067 }
 0x436   : > { %v2082_v11 = vsub.f32 %v2049_v60, %v2068_v44 }
 0x438   : > { %v2094_v47 = vmul.f32 1.442695, %v2082_v11  ;;  %v3888_v42 = vpop.permute.xlu0 %3887 }
 0x439   : > { %v3890_v54 = vunpack.i.h.bf16 %v3888_v42  ;;  %v3889_v33 = vunpack.i.l.bf16 %v3888_v42 }
 0x43a   : > { %3919 = vpow2.f32 %v2094_v47  ;;  %2124 = vadd.xlane.f32.xlu0 %v2123_v50 }
 0x43b   : > { %3921 = vpow2.f32 %v2092_v48  ;;  %v1761_v61 = vrot.slane %v3890_v54, 4  ;;  %v1705_v58 = vrot.slane %v3889_v33, 4 }
 0x43d   : > { %v2071_v40 = vpop.xlane.xlu2 %2070 }
 0x43e   : > { %v2083_v25 = vsub.f32 %v2050_v26, %v2071_v40 }
 0x440   : > { %v5273_v51 = vpop.eup %3919  ;;  %v2096_v7 = vmul.f32 1.442695, %v2083_v25 }
 0x441   : > { %v2114_v27 = vsel %vm2053_vm11, %v5273_v51, 0.0  ;;  %v5277_v59 = vpop.eup %3921 }
 0x442   : > { %2115 = vadd.xlane.f32.xlu2 %v2114_v27  ;;  %3923 = vpow2.f32 %v2096_v7  ;;  %v2111_v24 = vsel %vm2053_vm11, %v5277_v59, 0.0 }
 0x443   : > { %3925 = vpow2.f32 %v2098_v56 }
 0x445   : > { %v3878_v43 = vpop.permute.xlu1 %3877  ;;  %v3883_v62 = vpop.permute.xlu2 %3882 }
 0x446   : > { %v3880_v49 = vunpack.i.h.bf16 %v3878_v43  ;;  %v3879_v12 = vunpack.i.l.bf16 %v3878_v43  ;;  %v3885_v37 = vunpack.i.h.bf16 %v3883_v62  ;;  %v3884_v32 = vunpack.i.l.bf16 %v3883_v62 }
 0x448   : > { %v1762_v52 = vsel %vm1197_vm7, %v1761_v61, %v3880_v49  ;;  %v1763_v39 = vrot.slane %v3880_v49, 4  ;;  %v1706_v55 = vsel %vm1197_vm7, %v1705_v58, %v3879_v12  ;;  %v1707_v16 = vrot.slane %v3879_v12, 4  ;;  %v5291_v5 = vpop.eup %3923 }
 0x449   : > { %v1768_v19 = vperm.slane %v1762_v52, %v4877_v53  ;;  %v1712_v60 = vperm.slane %v1706_v55, %v4877_v53  ;;  %v1749_v57 = vrot.slane %v3885_v37, 4  ;;  %v1752_v41 = vsel %vm1197_vm7, %v3885_v37, %v1751_v8  ;;  %v5300_v34 = vpop.eup %3925 }
 0x44a   : > { %v1764_v10 = vsel %vm1197_vm7, %v3890_v54, %v1763_v39  ;;  %v1708_v26 = vsel %vm1197_vm7, %v3889_v33, %v1707_v16  ;;  %v1760_v2 = vperm.slane %v1752_v41, %v4877_v53  ;;  %v1693_v3 = vrot.slane %v3884_v32, 4  ;;  %2112 = vadd.xlane.f32.xlu2 %v2111_v24 }
 0x44b   : > { %v1772_v20 = vperm.slane %v1764_v10, %v4877_v53  ;;  %v1773_v22 = vrot.slane %v1768_v19, 4  ;;  %v1716_v0 = vperm.slane %v1708_v26, %v4877_v53  ;;  %v1717_v4 = vrot.slane %v1712_v60, 4 }
 0x44c   : > { %v1750_v13 = vsel %vm1197_vm7, %v1749_v57, %v5245_v29  ;;  %v1787_v9 = vrot.slane %v1760_v2, 4  ;;  %v1694_v1 = vsel %vm1197_vm7, %v1693_v3, %v5240_v63  ;;  %v1696_v30 = vsel %vm1197_vm7, %v3884_v32, %v1695_v35 }
 0x44d   : > { %v1785_v28 = vrot.slane %v1772_v20, 4  ;;  %v1729_v17 = vrot.slane %v1716_v0, 4  ;;  %v1756_v18 = vperm.slane %v1750_v13, %v4877_v53  ;;  %v1700_v31 = vperm.slane %v1694_v1, %v4877_v53 }
 0x44e   : > { %v1788_v36 = vsel %vm1197_vm7, %v1772_v20, %v1787_v9  ;;  %v1704_v38 = vperm.slane %v1696_v30, %v4877_v53  ;;  %v2117_v29 = vsel %vm2053_vm11, %v5291_v5, 0.0  ;;  %v2120_v62 = vsel %vm2053_vm11, %v5300_v34, 0.0 }
 0x44f   : > { %v1774_v44 = vsel %vm1197_vm7, %v1773_v22, %v1756_v18  ;;  %v1775_v63 = vrot.slane %v1756_v18, 4  ;;  %v1786_v45 = vsel %vm1197_vm7, %v1785_v28, %v1760_v2  ;;  %v1796_v11 = vperm.slane %v1788_v36, %v4909_v23  ;;  %2118 = vadd.xlane.f32.xlu1 %v2117_v29 }
 0x450   : > { %v1780_v47 = vperm.slane %v1774_v44, %v4909_v23  ;;  %v1792_v48 = vperm.slane %v1786_v45, %v4909_v23  ;;  %v1718_v50 = vsel %vm1197_vm7, %v1717_v4, %v1700_v31  ;;  %v1719_v40 = vrot.slane %v1700_v31, 4 }
 0x451   : > { %v1776_v42 = vsel %vm1197_vm7, %v1768_v19, %v1775_v63  ;;  %v1803_v25 = vrot.slane %v1796_v11, 4  ;;  %v1724_v14 = vperm.slane %v1718_v50, %v4909_v23  ;;  %v1730_v54 = vsel %vm1197_vm7, %v1729_v17, %v1704_v38 }
 0x452   : > { %v1784_v33 = vperm.slane %v1776_v42, %v4909_v23  ;;  %v1797_v7 = vrot.slane %v1780_v47, 4  ;;  %v1801_v27 = vrot.slane %v1792_v48, 4  ;;  %v1720_v56 = vsel %vm1197_vm7, %v1712_v60, %v1719_v40 }
 0x453   : > { %v1804_v61 = vsel %vm1197_vm7, 0.0, %v1803_v25  ;;  %v1870_v58 = vsel %vm1197_vm7, %v1803_v25, %v1792_v48  ;;  %v1731_v43 = vrot.slane %v1704_v38, 4  ;;  %v1728_v32 = vperm.slane %v1720_v56, %v4909_v23 }
 0x454   : > { %v1799_v49 = vrot.slane %v1784_v33, 4  ;;  %v1802_v12 = vsel %vm1197_vm7, 0.0, %v1801_v27  ;;  %v1874_v37 = vperm.slane %v1870_v58, %v4877_v53  ;;  %v1875_v35 = vrot.slane %v1804_v61, 4 }
 0x455   : > { %v1732_v8 = vsel %vm1197_vm7, %v1716_v0, %v1731_v43  ;;  %v1736_v24 = vperm.slane %v1730_v54, %v4909_v23  ;;  %v1741_v52 = vrot.slane %v1724_v14, 4  ;;  %v1798_v39 = vsel %vm1197_vm7, 0.0, %v1797_v7 }
 0x456   : > { %v1800_v55 = vsel %vm1197_vm7, 0.0, %v1799_v49  ;;  %v1859_v16 = vsel %vm1197_vm7, %v1799_v49, %v1780_v47  ;;  %v1740_v19 = vperm.slane %v1732_v8, %v4909_v23  ;;  %v1876_v41 = vsel %vm1197_vm7, %v1875_v35, %v1802_v12 }
 0x457   : > { %v1863_v60 = vperm.slane %v1859_v16, %v4877_v53  ;;  %v1864_v57 = vrot.slane %v1800_v55, 4  ;;  %v1895_v10 = vrot.slane %v1874_v37, 4  ;;  %2121 = vadd.xlane.f32.xlu1 %v2120_v62  ;;  %v1880_v26 = vperm.slane %v1876_v41, %v4877_v53 }
 0x458   : > { %v1743_v2 = vrot.slane %v1728_v32, 4  ;;  %v1745_v3 = vrot.slane %v1736_v24, 4  ;;  %v1747_v20 = vrot.slane %v1740_v19, 4  ;;  %v1742_v0 = vsel %vm1197_vm7, 0.0, %v1741_v52 }
 0x459   : > { %v1865_v22 = vsel %vm1197_vm7, %v1864_v57, %v1798_v39  ;;  %v1883_v4 = vrot.slane %v1863_v60, 4  ;;  %v1896_v29 = vsel %vm1197_vm7, %v1880_v26, %v1895_v10  ;;  %v1893_v44 = vrot.slane %v1880_v26, 4 }
 0x45a   : > { %v1744_v13 = vsel %vm1197_vm7, 0.0, %v1743_v2  ;;  %v1746_v9 = vsel %vm1197_vm7, 0.0, %v1745_v3  ;;  %v1748_v1 = vsel %vm1197_vm7, 0.0, %v1747_v20  ;;  %v1805_v30 = vsel %vm1197_vm7, %v1743_v2, %v1724_v14 }
 0x45b   : > { %v1809_v28 = vperm.slane %v1805_v30, %v4877_v53  ;;  %v1810_v17 = vrot.slane %v1744_v13, 4  ;;  %v1816_v18 = vsel %vm1197_vm7, %v1747_v20, %v1736_v24  ;;  %v1821_v31 = vrot.slane %v1748_v1, 4 }
 0x45c   : > { %v1820_v36 = vperm.slane %v1816_v18, %v4877_v53  ;;  %v1869_v38 = vperm.slane %v1865_v22, %v4877_v53  ;;  %v1904_v47 = vperm.slane %v1896_v29, %v4909_v23  ;;  %v1894_v33 = vsel %vm1197_vm7, %v1893_v44, %v1874_v37 }
 0x45d   : > { %v1811_v63 = vsel %vm1197_vm7, %v1810_v17, %v1742_v0  ;;  %v1822_v45 = vsel %vm1197_vm7, %v1821_v31, %v1746_v9  ;;  %v1829_v11 = vrot.slane %v1809_v28, 4  ;;  %v1900_v39 = vperm.slane %v1894_v33, %v4909_v23 }
 0x45e   : > { %v1826_v48 = vperm.slane %v1822_v45, %v4877_v53  ;;  %v1841_v50 = vrot.slane %v1820_v36, 4  ;;  %v1815_v40 = vperm.slane %v1811_v63, %v4877_v53  ;;  %v1884_v42 = vsel %vm1197_vm7, %v1869_v38, %v1883_v4 }
 0x45f   : > { %v1892_v25 = vperm.slane %v1884_v42, %v4909_v23  ;;  %v1909_v14 = vrot.slane %v1904_v47, 4  ;;  %v1881_v54 = vrot.slane %v1869_v38, 4  ;;  %v1905_v26 = vrot.slane %v1900_v39, 4 }
 0x460   : > { %v1830_v7 = vsel %vm1197_vm7, %v1815_v40, %v1829_v11  ;;  %v1842_v27 = vsel %vm1197_vm7, %v1826_v48, %v1841_v50  ;;  %v1827_v56 = vrot.slane %v1815_v40, 4  ;;  %v1839_v61 = vrot.slane %v1826_v48, 4 }
 0x461   : > { %v1838_v58 = vperm.slane %v1830_v7, %v4909_v23  ;;  %v1850_v43 = vperm.slane %v1842_v27, %v4909_v23  ;;  %v1910_v62 = vsel %vm1197_vm7, %v1909_v14, %v1892_v25  ;;  %v1882_v49 = vsel %vm1197_vm7, %v1881_v54, %v1863_v60 }
 0x462   : > { %v1918_v12 = vpack.c.bf16 %v1910_v62, %v1910_v62  ;;  %v1828_v32 = vsel %vm1197_vm7, %v1827_v56, %v1809_v28  ;;  %v1840_v35 = vsel %vm1197_vm7, %v1839_v61, %v1820_v36  ;;  %v1888_v37 = vperm.slane %v1882_v49, %v4909_v23 }
 0x463   : > { %v1855_v8 = vrot.slane %v1850_v43, 4  ;;  %v1834_v24 = vperm.slane %v1828_v32, %v4909_v23  ;;  %v1846_v52 = vperm.slane %v1840_v35, %v4909_v23  ;;  %v1857_v19 = vrot.slane %v1838_v58, 4 }
 0x464   : > { %v2214_v55 = vunpack.c.l.b16 %v1918_v12  ;;  %v1907_v16 = vrot.slane %v1888_v37, 4  ;;  %v1911_v57 = vrot.slane %v1892_v25, 4  ;;  %v1906_v4 = vsel %vm1197_vm7, %v1905_v26, %v1888_v37 }
 0x465   : > { %v1856_v60 = vsel %vm1197_vm7, %v1855_v8, %v1838_v58  ;;  %v1851_v41 = vrot.slane %v1846_v52, 4  ;;  %v1853_v10 = vrot.slane %v1834_v24, 4  ;;  %v1858_v3 = vsel %vm1197_vm7, %v1850_v43, %v1857_v19 }
 0x466   : > { %v1917_v2 = vpack.c.bf16 %v1856_v60, %v1856_v60  ;;  %v1912_v20 = vsel %vm1197_vm7, %v1904_v47, %v1911_v57  ;;  %v1908_v22 = vsel %vm1197_vm7, %v1900_v39, %v1907_v16  ;;  %v1919_v13 = vpack.c.bf16 %v1858_v3, %v1858_v3 }
 0x467   : > { %v1852_v0 = vsel %vm1197_vm7, %v1851_v41, %v1834_v24  ;;  %v1920_v9 = vpack.c.bf16 %v1912_v20, %v1912_v20  ;;  %v1914_v28 = vpack.c.bf16 %v1906_v4, %v1906_v4  ;;  %v1854_v17 = vsel %vm1197_vm7, %v1846_v52, %v1853_v10 }
 0x468   : > { %v2213_v1 = vunpack.c.l.b16 %v1917_v2  ;;  %v1913_v30 = vpack.c.bf16 %v1852_v0, %v1852_v0  ;;  %v2241_v18 = vunpack.c.l.b16 %v1919_v13  ;;  %v1915_v36 = vpack.c.bf16 %v1854_v17, %v1854_v17 }
 0x469   : > { %v2242_v31 = vunpack.c.l.b16 %v1920_v9  ;;  %v1916_v38 = vpack.c.bf16 %v1908_v22, %v1908_v22  ;;  %v2158_v63 = vunpack.c.l.b16 %v1914_v28 }
 0x46a   : > { %v2215_v29 = vpack.c.b16 %v2214_v55, %v2213_v1  ;;  %v2157_v44 = vunpack.c.l.b16 %v1913_v30  ;;  %v2185_v11 = vunpack.c.l.b16 %v1915_v36 }
 0x46b   : > { %v2243_v45 = vpack.c.b16 %v2242_v31, %v2241_v18  ;;  %v2186_v47 = vunpack.c.l.b16 %v1916_v38 }
 0x46c   : > { %2227 = vmatpush.bf16.msrb.mxu3 %v2215_v29  ;;  %v2159_v48 = vpack.c.b16 %v2158_v63, %v2157_v44 }
 0x46d   : > { %2255 = vmatpush.bf16.msra.mxu0 %v2243_v45  ;;  %v2187_v50 = vpack.c.b16 %v2186_v47, %v2185_v11 }
 0x46e   : > { %2171 = vmatpush.bf16.msrb.mxu2 %v2159_v48 }
 0x472   : > { %2199 = vmatpush.bf16.msra.mxu2 %v2187_v50 }
 0x495   : > { %v2104_v40 = vpop.xlane.xlu1 %2103 }
 0x496   : > { %3927 = vrcp.f32 %v2104_v40 }
 0x49c   : > { %v3928_v25 = vpop.eup %3927 }
 0x49d   : > { %v2107_v42 = vpop.xlane.xlu0 %2106  ;;  %v2134_v14 = vmul.f32 %v3928_v25, %v5256_v6 }
 0x49e   : > { %3929 = vrcp.f32 %v2107_v42 }
 0x49f   : > { %v2142_v33 = vpack.c.bf16 %v2134_v14, %v2134_v14 }
 0x4a1   : > { %v2152_v56 = vunpack.c.l.b16 %v2142_v33 }
 0x4a4   : > { %v3930_v54 = vpop.eup %3929 }
 0x4a5   : > { %v2135_v7 = vmul.f32 %v3930_v54, %v5260_v21  ;;  %v2110_v43 = vpop.xlane.xlu0 %2109 }
 0x4a6   : > { %3931 = vrcp.f32 %v2110_v43 }
 0x4a7   : > { %v2143_v27 = vpack.c.bf16 %v2135_v7, %v2135_v7 }
 0x4a9   : > { %v2153_v61 = vunpack.c.l.b16 %v2143_v27 }
 0x4ab   : > { %v2154_v58 = vpack.c.b16 %v2153_v61, %v2152_v56 }
 0x4ac   : > { %v3932_v12 = vpop.eup %3931 }
 0x4ad   : > { %3418 = vmatmul.msk.bf16.vlgmr.msrb.gmra.mxu2 %vm2053_vm11, %v2154_v58  ;;  %v2136_v32 = vmul.f32 %v3932_v12, %v5264_v15  ;;  %v2125_v6 = vpop.xlane.xlu0 %2124  ;;  %v3622_v12 = vld [vmem:[%s4775_s29 + $0x38] sm:$0xff] }
 0x4ae   : > { %2563 = vmatpush.bf16.msrb.mxu1 %v3622_v12 }
 0x4af   : > { %v2144_v8 = vpack.c.bf16 %v2136_v32, %v2136_v32 }
 0x4b1   : > { %v2180_v16 = vunpack.c.l.b16 %v2144_v8 }
 0x4b5   : > { %v2116_v62 = vpop.xlane.xlu2 %2115 }
 0x4b6   : > { %3933 = vrcp.f32 %v2116_v62 }
 0x4bc   : > { %v3934_v37 = vpop.eup %3933 }
 0x4bd   : > { %v2113_v49 = vpop.xlane.xlu2 %2112  ;;  %v2138_v52 = vmul.f32 %v3934_v37, %v5273_v51 }
 0x4be   : > { %3935 = vrcp.f32 %v2113_v49 }
 0x4bf   : > { %v2146_v57 = vpack.c.bf16 %v2138_v52, %v2138_v52 }
 0x4c1   : > { %v2208_v3 = vunpack.c.l.b16 %v2146_v57 }
 0x4c2   : > { %v2119_v35 = vpop.xlane.xlu1 %2118 }
 0x4c3   : > { %3937 = vrcp.f32 %v2119_v35 }
 0x4c4   : > { %v3936_v21 = vpop.eup %3935  ;;  %3939 = vrcp.f32 %v2125_v6 }
 0x4c5   : > { %v2137_v24 = vmul.f32 %v3936_v21, %v5277_v59 }
 0x4c7   : > { %v2145_v39 = vpack.c.bf16 %v2137_v24, %v2137_v24 }
 0x4c9   : > { %v3938_v55 = vpop.eup %3937  ;;  %v2181_v19 = vunpack.c.l.b16 %v2145_v39 }
 0x4ca   : > { %v2139_v60 = vmul.f32 %v3938_v55, %v5291_v5  ;;  %v2122_v41 = vpop.xlane.xlu1 %2121  ;;  %v3940_v15 = vpop.eup %3939 }
 0x4cb   : > { %v2182_v10 = vpack.c.b16 %v2181_v19, %v2180_v16  ;;  %3941 = vrcp.f32 %v2122_v41  ;;  %v2141_v2 = vmul.f32 %v3940_v15, %v5268_v46 }
 0x4cc   : > { %v2147_v26 = vpack.c.bf16 %v2139_v60, %v2139_v60 }
 0x4cd   : > { %3419 = vmatmul.msk.bf16.vlgmr.msra.gmra.mxu2 %vm2053_vm11, %v2182_v10  ;;  %v2149_v22 = vpack.c.bf16 %v2141_v2, %v2141_v2 }
 0x4ce   : > { %v2209_v59 = vunpack.c.l.b16 %v2147_v26 }
 0x4cf   : > { %v2237_v5 = vunpack.c.l.b16 %v2149_v22 }
 0x4d0   : > { %v2210_v20 = vpack.c.b16 %v2209_v59, %v2208_v3 }
 0x4d1   : > { %v3942_v51 = vpop.eup %3941 }
 0x4d2   : > { %v2140_v0 = vmul.f32 %v3942_v51, %v5300_v34  ;;  %3420 = vmatmul.msk.bf16.vlgmr.msrb.gmra.mxu3 %vm2053_vm11, %v2210_v20 }
 0x4d4   : > { %v2148_v4 = vpack.c.bf16 %v2140_v0, %v2140_v0 }
 0x4d6   : > { %v2236_v13 = vunpack.c.l.b16 %v2148_v4 }
 0x4d8   : > { %v2238_v9 = vpack.c.b16 %v2237_v5, %v2236_v13 }
 0x4da   : > { %3421 = vmatmul.msk.bf16.vlgmr.msra.gmra.mxu0 %vm2053_vm11, %v2238_v9 }
 0x530   : > { %v2173_v1 = vpop.f32.mrf.mxu2 }
 0x531   : > { %v2264_v17 = vrot.slane %v2173_v1, 4 }
 0x538   : > { %v2175_v30 = vpop.f32.mrf.mxu2 }
 0x539   : > { %v2320_v33 = vrot.slane %v2175_v30, 4 }
 0x550   : > { %v2201_v28 = vpop.f32.mrf.mxu2 }
 0x551   : > { %v2276_v46 = vrot.slane %v2201_v28, 4 }
 0x555   : > { %v2229_v18 = vpop.f32.mrf.mxu3 }
 0x556   : > { %v2262_v31 = vrot.slane %v2229_v18, 4  ;;  %v2265_v36 = vsel %vm1197_vm7, %v2229_v18, %v2264_v17 }
 0x557   : > { %v2273_v38 = vperm.slane %v2265_v36, %v4877_v53  ;;  %v2257_v34 = vpop.f32.mrf.mxu0 }
 0x558   : > { %v2263_v29 = vsel %vm1197_vm7, %v2262_v31, %v2173_v1  ;;  %v2274_v44 = vrot.slane %v2257_v34, 4  ;;  %v2277_v63 = vsel %vm1197_vm7, %v2257_v34, %v2276_v46  ;;  %v2203_v54 = vpop.f32.mrf.mxu2 }
 0x559   : > { %v2269_v45 = vperm.slane %v2263_v29, %v4877_v53  ;;  %v2300_v11 = vrot.slane %v2273_v38, 4  ;;  %v2285_v47 = vperm.slane %v2277_v63, %v4877_v53  ;;  %v2332_v6 = vrot.slane %v2203_v54, 4 }
 0x55a   : > { %v2275_v48 = vsel %vm1197_vm7, %v2274_v44, %v2201_v28 }
 0x55b   : > { %v2288_v50 = vrot.slane %v2269_v45, 4  ;;  %v2281_v40 = vperm.slane %v2275_v48, %v4877_v53  ;;  %v2298_v42 = vrot.slane %v2285_v47, 4  ;;  %v2301_v25 = vsel %vm1197_vm7, %v2285_v47, %v2300_v11 }
 0x55c   : > { %v2309_v14 = vperm.slane %v2301_v25, %v4909_v23 }
 0x55d   : > { %v2286_v7 = vrot.slane %v2281_v40, 4  ;;  %v2289_v27 = vsel %vm1197_vm7, %v2281_v40, %v2288_v50  ;;  %v2299_v56 = vsel %vm1197_vm7, %v2298_v42, %v2273_v38  ;;  %v2231_v61 = vpop.f32.mrf.mxu3 }
 0x55e   : > { %v2297_v58 = vperm.slane %v2289_v27, %v4909_v23  ;;  %v2305_v43 = vperm.slane %v2299_v56, %v4909_v23  ;;  %v2316_v62 = vrot.slane %v2309_v14, 4  ;;  %v2318_v49 = vrot.slane %v2231_v61, 4 }
 0x55f   : > { %v2287_v32 = vsel %vm1197_vm7, %v2286_v7, %v2269_v45  ;;  %v2321_v35 = vsel %vm1197_vm7, %v2231_v61, %v2320_v33  ;;  %v2259_v19 = vpop.f32.mrf.mxu0 }
 0x560   : > { %v2293_v37 = vperm.slane %v2287_v32, %v4909_v23  ;;  %v2312_v21 = vrot.slane %v2297_v58, 4  ;;  %v2314_v8 = vrot.slane %v2305_v43, 4  ;;  %v2317_v24 = vsel %vm1197_vm7, 0.0, %v2316_v62 }
 0x561   : > { %v2385_v52 = vsel %vm1197_vm7, %v2316_v62, %v2305_v43  ;;  %v2390_v39 = vrot.slane %v2317_v24, 4  ;;  %v2319_v55 = vsel %vm1197_vm7, %v2318_v49, %v2175_v30  ;;  %v2329_v16 = vperm.slane %v2321_v35, %v4877_v53 }
 0x562   : > { %v2310_v57 = vrot.slane %v2293_v37, 4  ;;  %v2313_v60 = vsel %vm1197_vm7, 0.0, %v2312_v21  ;;  %v2315_v41 = vsel %vm1197_vm7, 0.0, %v2314_v8  ;;  %v2374_v15 = vsel %vm1197_vm7, %v2312_v21, %v2293_v37 }
 0x563   : > { %v2379_v10 = vrot.slane %v2313_v60, 4  ;;  %v2389_v26 = vperm.slane %v2385_v52, %v4877_v53  ;;  %v2391_v2 = vsel %vm1197_vm7, %v2390_v39, %v2315_v41  ;;  %v2325_v3 = vperm.slane %v2319_v55, %v4877_v53 }
 0x564   : > { %v2395_v59 = vperm.slane %v2391_v2, %v4877_v53  ;;  %v2356_v20 = vrot.slane %v2329_v16, 4  ;;  %v2330_v51 = vrot.slane %v2259_v19, 4  ;;  %v2333_v22 = vsel %vm1197_vm7, %v2259_v19, %v2332_v6 }
 0x565   : > { %v2410_v0 = vrot.slane %v2389_v26, 4  ;;  %v2344_v4 = vrot.slane %v2325_v3, 4  ;;  %v2341_v5 = vperm.slane %v2333_v22, %v4877_v53  ;;  %v2311_v13 = vsel %vm1197_vm7, 0.0, %v2310_v57 }
 0x566   : > { %v2331_v9 = vsel %vm1197_vm7, %v2330_v51, %v2203_v54  ;;  %v2378_v1 = vperm.slane %v2374_v15, %v4877_v53  ;;  %v2380_v30 = vsel %vm1197_vm7, %v2379_v10, %v2311_v13  ;;  %v2408_v28 = vrot.slane %v2395_v59, 4 }
 0x567   : > { %v2337_v17 = vperm.slane %v2331_v9, %v4877_v53  ;;  %v2354_v46 = vrot.slane %v2341_v5, 4  ;;  %v2357_v18 = vsel %vm1197_vm7, %v2341_v5, %v2356_v20  ;;  %v2384_v31 = vperm.slane %v2380_v30, %v4877_v53 }
 0x568   : > { %v2365_v36 = vperm.slane %v2357_v18, %v4909_v23  ;;  %v2398_v44 = vrot.slane %v2378_v1, 4  ;;  %v2411_v47 = vsel %vm1197_vm7, %v2395_v59, %v2410_v0  ;;  %v2409_v40 = vsel %vm1197_vm7, %v2408_v28, %v2389_v26 }
 0x569   : > { %v2342_v38 = vrot.slane %v2337_v17, 4  ;;  %v2345_v34 = vsel %vm1197_vm7, %v2337_v17, %v2344_v4  ;;  %v2355_v29 = vsel %vm1197_vm7, %v2354_v46, %v2329_v16  ;;  %v2396_v50 = vrot.slane %v2384_v31, 4 }
 0x56a   : > { %v2353_v63 = vperm.slane %v2345_v34, %v4909_v23  ;;  %v2361_v45 = vperm.slane %v2355_v29, %v4909_v23  ;;  %v2372_v11 = vrot.slane %v2365_v36, 4  ;;  %v2399_v27 = vsel %vm1197_vm7, %v2384_v31, %v2398_v44  ;;  %v3621_v29 = vld [vmem:[%s4775_s29 + $0x30] sm:$0xff]  ;;  %v3620_v44 = vld [vmem:[%s4775_s29 + $0x28] sm:$0xff] }
 0x56b   : > { %v2343_v48 = vsel %vm1197_vm7, %v2342_v38, %v2325_v3  ;;  %v2419_v56 = vperm.slane %v2411_v47, %v4909_v23  ;;  %v2397_v21 = vsel %vm1197_vm7, %v2396_v50, %v2378_v1  ;;  %v2407_v24 = vperm.slane %v2399_v27, %v4909_v23  ;;  %2564 = vmatpush.bf16.msrb.mxu1 %v3621_v29  ;;  %v3616_v47 = vld [vmem:[%s4775_s29 + $0x8] sm:$0xff] }
 0x56c   : > { %v2349_v42 = vperm.slane %v2343_v48, %v4909_v23  ;;  %v2368_v25 = vrot.slane %v2353_v63, 4  ;;  %v2370_v14 = vrot.slane %v2361_v45, 4  ;;  %v2373_v54 = vsel %vm1197_vm7, 0.0, %v2372_v11  ;;  %v3619_v63 = vld [vmem:[%s4775_s29 + $0x20] sm:$0xff] }
 0x56d   : > { %v2439_v33 = vsel %vm1197_vm7, %v2372_v11, %v2361_v45  ;;  %v2444_v7 = vrot.slane %v2373_v54, 4  ;;  %v2403_v16 = vperm.slane %v2397_v21, %v4909_v23  ;;  %v2415_v19 = vperm.slane %v2409_v40, %v4909_v23  ;;  %v3618_v45 = vld [vmem:[%s4775_s29 + $0x18] sm:$0xff]  ;;  %v3617_v11 = vld [vmem:[%s4775_s29 + $0x10] sm:$0xff]  ;;  %v3615_v48 = vld [vmem:[%s4775_s29] sm:$0xff]  ;;  %s5735_s29 = scalar_lea.vmem [#allocation14], %s4765_s23 }
 0x56e   : > { %v2366_v61 = vrot.slane %v2349_v42, 4  ;;  %v2369_v58 = vsel %vm1197_vm7, 0.0, %v2368_v25  ;;  %v2371_v43 = vsel %vm1197_vm7, 0.0, %v2370_v14  ;;  %v2428_v62 = vsel %vm1197_vm7, %v2368_v25, %v2349_v42  ;;  %v3954_v21 = vld [vmem:[%s4820_s6 + $0x8] sm:$0xff]  ;;  %v3631_v29 = vld [vmem:[%s4783_s2 + $0x44] sm:$0xf] }
 0x56f   : > { %v2433_v49 = vrot.slane %v2369_v58, 4  ;;  %v2443_v12 = vperm.slane %v2439_v33, %v4877_v53  ;;  %v2445_v32 = vsel %vm1197_vm7, %v2444_v7, %v2371_v43  ;;  %v2432_v6 = vperm.slane %v2428_v62, %v4877_v53  ;;  %2565 = vmatpush.bf16.msrb.mxu1 %v3620_v44 }
 0x570   : > { %v2449_v35 = vperm.slane %v2445_v32, %v4877_v53  ;;  %v2367_v37 = vsel %vm1197_vm7, 0.0, %v2366_v61  ;;  %v2424_v60 = vrot.slane %v2419_v56, 4  ;;  %v2420_v26 = vrot.slane %v2415_v19, 4 }
 0x571   : > { %v2464_v8 = vrot.slane %v2443_v12, 4  ;;  %v2434_v52 = vsel %vm1197_vm7, %v2433_v49, %v2367_v37  ;;  %v2452_v39 = vrot.slane %v2432_v6, 4  ;;  %v2426_v59 = vrot.slane %v2407_v24, 4 }
 0x572   : > { %v2438_v55 = vperm.slane %v2434_v52, %v4877_v53  ;;  %v2462_v57 = vrot.slane %v2449_v35, 4  ;;  %v2421_v0 = vsel %vm1197_vm7, %v2420_v26, %v2403_v16  ;;  %v2422_v5 = vrot.slane %v2403_v16, 4 }
 0x573   : > { %v2465_v41 = vsel %vm1197_vm7, %v2449_v35, %v2464_v8  ;;  %v2425_v9 = vsel %vm1197_vm7, %v2424_v60, %v2407_v24  ;;  %v2427_v17 = vsel %vm1197_vm7, %v2419_v56, %v2426_v59  ;;  %2566 = vmatpush.bf16.msrb.mxu1 %v3619_v63  ;;  %v4419_v24 = vmov 128.0   ;;  %v3490_v63 = vld [vmem:[%s4783_s2 + $0x48] sm:$0xf0] }
 0x574   : > { %v2453_v15 = vsel %vm1197_vm7, %v2438_v55, %v2452_v39  ;;  %v2473_v10 = vperm.slane %v2465_v41, %v4909_v23  ;;  %v2450_v2 = vrot.slane %v2438_v55, 4  ;;  %v2463_v20 = vsel %vm1197_vm7, %v2462_v57, %v2443_v12 }
 0x575   : > { %v2461_v3 = vperm.slane %v2453_v15, %v4909_v23  ;;  %v2469_v22 = vperm.slane %v2463_v20, %v4909_v23  ;;  %3943 = vrcp.f32 %v4419_v24  ;;  %v3512_v20 = vld [vmem:[%s4783_s2 + $0x70] sm:$0xf] }
 0x576   : > { %v2478_v53 = vrot.slane %v2473_v10, 4  ;;  %v2451_v51 = vsel %vm1197_vm7, %v2450_v2, %v2432_v6  ;;  %v3953_v6 = vld [vmem:[%s4820_s6] sm:$0xff] }
 0x577   : > { %v2480_v4 = vrot.slane %v2461_v3, 4  ;;  %v2457_v13 = vperm.slane %v2451_v51, %v4909_v23  ;;  %v2474_v30 = vrot.slane %v2469_v22, 4  ;;  %v2423_v23 = vsel %vm1197_vm7, %v2415_v19, %v2422_v5  ;;  %2567 = vmatpush.bf16.msrb.mxu1 %v3618_v45  ;;  %v3637_v51 = vld [vmem:[%s4783_s2 + $0x74] sm:$0xf]  ;;  %v3504_v5 = vld [vmem:[%s4783_s2 + $0x60] sm:$0xf] }
 0x578   : > { %v2479_v1 = vsel %vm1197_vm7, %v2478_v53, %v2461_v3  ;;  %v3638_v53 = vld [vmem:[%s4783_s2 + $0x74] sm:$0xf0]  ;;  %v3493_v45 = vor.u32 %v3631_v29, %v3490_v63 }
 0x579   : > { %v3896_v28 = vpack.i.bf16 %v2479_v1, %v2425_v9  ;;  %v2481_v46 = vsel %vm1197_vm7, %v2473_v10, %v2480_v4  ;;  %v2476_v18 = vrot.slane %v2457_v13, 4  ;;  %v2475_v36 = vsel %vm1197_vm7, %v2474_v30, %v2457_v13  ;;  %v3636_v13 = vld [vmem:[%s4783_s2 + $0x64] sm:$0xf0]  ;;  %v3635_v9 = vld [vmem:[%s4783_s2 + $0x64] sm:$0xf] }
 0x57a   : > { %v3901_v31 = vpack.i.bf16 %v2481_v46, %v2427_v17  ;;  %v3505_v1 = vor.u32 %v3636_v13, %v3504_v5  ;;  %v3506_v30 = vld [vmem:[%s4783_s2 + $0x68] sm:$0xf0]  ;;  %v3496_v17 = vld [vmem:[%s4783_s2 + $0x50] sm:$0xf]  ;;  %v3634_v46 = vld [vmem:[%s4783_s2 + $0x54] sm:$0xf0] }
 0x57b   : > { %3897 = vrot.lane.b32.xlu1 %v3896_v28, %s4413_s9  ;;  %v2477_v38 = vsel %vm1197_vm7, %v2469_v22, %v2476_v18  ;;  %2568 = vmatpush.bf16.msrb.mxu1 %v3617_v11  ;;  %v3944_v52 = vpop.eup %3943  ;;  %v3513_v22 = vor.u32 %v3638_v53, %v3512_v20  ;;  %v3509_v28 = vor.u32 %v3635_v9, %v3506_v30  ;;  %v3633_v18 = vld [vmem:[%s4783_s2 + $0x54] sm:$0xf]  ;;  %v3480_v11 = vld [vmem:[%s4783_s2 + $0x30] sm:$0xf]  ;;  %v3652_v20 = vld [vmem:[%s4786_s4 + $0x68] sm:$0xff] }
 0x57c   : > { %3902 = vrot.lane.b32.xlu0 %v3901_v31, %s4415_s27  ;;  %v3891_v34 = vpack.i.bf16 %v2477_v38, %v2423_v23  ;;  %v2582_v39 = vmul.f32 128.0, %v3944_v52  ;;  %vm2586_vm14 = vweird.f32 %v3944_v52  ;;  %v3497_v31 = vor.u32 %v3634_v46, %v3496_v17  ;;  %v3488_v38 = vld [vmem:[%s4783_s2 + $0x40] sm:$0xf] }
 0x57d   : > { %2772 = vmatpush.bf16.msrb.mxu2 %v3513_v22  ;;  %v3643_v22 = vld [vmem:[%s4786_s4 + $0x20] sm:$0xff] }
 0x57e   : > { %3892 = vrot.lane.b32.xlu2 %v3891_v34, %s4414_s22  ;;  %v2583_v55 = vsub.f32 1.0, %v2582_v39  ;;  %v3632_v34 = vld [vmem:[%s4783_s2 + $0x44] sm:$0xf0]  ;;  %v3654_v39 = vld [vmem:[%s4786_s4 + $0x78] sm:$0xff] }
 0x57f   : > { %2569 = vmatpush.bf16.msrb.mxu1 %v3616_v47  ;;  %v3489_v44 = vor.u32 %v3632_v34, %v3488_v38  ;;  %v3630_v47 = vld [vmem:[%s4783_s2 + $0x34] sm:$0xf0]  ;;  %v3907_v34 = vld [vmem:[%s5735_s29] ss:$0 sm:$0xff] }
 0x580   : > { %v2584_v16 = vmul.f32 %v3944_v52, %v2583_v55 }
 0x581   : > { %2773 = vmatpush.bf16.msrb.mxu2 %v3505_v1 }
 0x582   : > { %v2585_v19 = vadd.f32 %v3944_v52, %v2584_v16 }
 0x583   : > { %2570 = vmatpush.bf16.msrb.mxu1 %v3615_v48  ;;  %v3629_v48 = vld [vmem:[%s4783_s2 + $0x34] sm:$0xf] }
 0x584   : > { %v5480_v57 = vsel %vm2586_vm14, %v3944_v52, %v2585_v19  ;;  %v3646_v52 = vld [vmem:[%s4786_s4 + $0x38] sm:$0xff] }
 0x585   : > { %2774 = vmatpush.bf16.msrb.mxu2 %v3497_v31  ;;  %2905 = vmatpush.bf16.msrb.mxu0 %v3646_v52 }
 0x587   : > { %2919 = vmatpush.bf16.msra.mxu1 %v3654_v39 }
 0x589   : > { %2775 = vmatpush.bf16.msrb.mxu2 %v3489_v44 }
 0x5d8   : > { %v3893_v50 = vpop.permute.xlu2 %3892 }
 0x5d9   : > { %v3895_v40 = vunpack.i.h.bf16 %v3893_v50  ;;  %v3894_v42 = vunpack.i.l.bf16 %v3893_v50  ;;  %v3481_v50 = vor.u32 %v3630_v47, %v3480_v11  ;;  %v3650_v11 = vld [vmem:[%s4786_s4 + $0x58] sm:$0xff]  ;;  %v3641_v47 = vld [vmem:[%s4786_s4 + $0x10] sm:$0xff] }
 0x5db   : > { %v2506_v7 = vsel %vm1931_vm8, %v2421_v0, %v3894_v42  ;;  %v2507_v27 = vsel %vm1931_vm8, %v2475_v36, %v3895_v40  ;;  %v3514_v0 = vld [vmem:[%s4783_s2 + $0x78] sm:$0xf0]  ;;  %2776 = vmatpush.bf16.msrb.mxu2 %v3481_v50  ;;  %v3648_v50 = vld [vmem:[%s4786_s4 + $0x48] sm:$0xff] }
 0x5dc   : > { %v3517_v4 = vor.u32 %v3637_v51, %v3514_v0  ;;  %v3498_v36 = vld [vmem:[%s4783_s2 + $0x58] sm:$0xf0]  ;;  %v3651_v0 = vld [vmem:[%s4786_s4 + $0x60] sm:$0xff] }
 0x5dd   : > { %v3501_v23 = vor.u32 %v3633_v18, %v3498_v36  ;;  %v3482_v40 = vld [vmem:[%s4783_s2 + $0x38] sm:$0xf0]  ;;  %v3906_v18 = vld [vmem:[%s863_s12] ss:$0 sm:$0xff] }
 0x5de   : > { %2786 = vmatpush.bf16.msra.mxu3 %v3517_v4  ;;  %v3485_v42 = vor.u32 %v3629_v48, %v3482_v40  ;;  %v3640_v48 = vld [vmem:[%s4786_s4 + $0x8] sm:$0xff]  ;;  %v3639_v40 = vld [vmem:[%s4786_s4] sm:$0xff] }
 0x5e2   : > { %2787 = vmatpush.bf16.msra.mxu3 %v3509_v28 }
 0x5e6   : > { %2788 = vmatpush.bf16.msra.mxu3 %v3501_v23 }
 0x5ea   : > { %2789 = vmatpush.bf16.msra.mxu3 %v3493_v45  ;;  %v3642_v45 = vld [vmem:[%s4786_s4 + $0x18] sm:$0xff] }
 0x5ed   : > { %v3898_v25 = vpop.permute.xlu1 %3897 }
 0x5ee   : > { %v3900_v14 = vunpack.i.h.bf16 %v3898_v25  ;;  %v3899_v54 = vunpack.i.l.bf16 %v3898_v25  ;;  %v3903_v33 = vpop.permute.xlu0 %3902  ;;  %v3472_v25 = vld [vmem:[%s4783_s2 + $0x20] sm:$0xf]  ;;  %2790 = vmatpush.bf16.msra.mxu3 %v3485_v42 }
 0x5ef   : > { %v3905_v56 = vunpack.i.h.bf16 %v3903_v33  ;;  %v3904_v61 = vunpack.i.l.bf16 %v3903_v33  ;;  %v3647_v42 = vld [vmem:[%s4786_s4 + $0x40] sm:$0xff] }
 0x5f0   : > { %v2509_v58 = vsel %vm2508_vm12, %v2506_v7, %v3899_v54  ;;  %v2510_v43 = vsel %vm2508_vm12, %v2507_v27, %v3900_v14  ;;  %v3628_v14 = vld [vmem:[%s4783_s2 + $0x24] sm:$0xf0]  ;;  %v3627_v54 = vld [vmem:[%s4783_s2 + $0x24] sm:$0xf]  ;;  %v3474_v27 = vld [vmem:[%s4783_s2 + $0x28] sm:$0xf0] }
 0x5f1   : > { %v2512_v62 = vsel %vm2511_vm13, %v2509_v58, %v3904_v61  ;;  %v2513_v49 = vsel %vm2511_vm13, %v2510_v43, %v3905_v56  ;;  %v3473_v7 = vor.u32 %v3628_v14, %v3472_v25  ;;  %v3464_v56 = vld [vmem:[%s4783_s2 + $0x10] sm:$0xf]  ;;  %v3626_v61 = vld [vmem:[%s4783_s2 + $0x14] sm:$0xf0]  ;;  %v3477_v43 = vor.u32 %v3627_v54, %v3474_v27  ;;  %v2650_v25 = vld [vmem:[%s4804_s25] sm:$0x3] }
 0x5f2   : > { %v2514_v12 = vpack.c.bf16 %v2513_v49, %v2512_v62  ;;  %v3625_v62 = vld [vmem:[%s4783_s2 + $0x14] sm:$0xf]  ;;  %v3466_v49 = vld [vmem:[%s4783_s2 + $0x18] sm:$0xf0] }
 0x5f3   : > { %2777 = vmatpush.bf16.msrb.mxu2 %v3473_v7  ;;  %2791 = vmatpush.bf16.msra.mxu3 %v3477_v43  ;;  %v2689_v7 = vperm.slane %v2650_v25, 1 }
 0x5f4   : > { %2571 = vmatmul.bf16.vlgmr.msrb.gmra.mxu1 %v2514_v12 }
 0x671   : > { %v2572_v32 = vpop.f32.mrf.mxu1 }
 0x672   : > { %v2573_v35 = vadd.f32 %v3953_v6, %v2572_v32  ;;  %v3465_v32 = vor.u32 %v3626_v61, %v3464_v56  ;;  %v3469_v6 = vor.u32 %v3625_v62, %v3466_v49 }
 0x674   : > { %2577 = vadd.xlane.f32.xlu2 %v2573_v35  ;;  %2778 = vmatpush.bf16.msrb.mxu2 %v3465_v32 }
 0x675   : > { %2792 = vmatpush.bf16.msra.mxu3 %v3469_v6 }
 0x679   : > { %v2574_v37 = vpop.f32.mrf.mxu1 }
 0x67a   : > { %v2575_v8 = vadd.f32 %v3954_v21, %v2574_v37  ;;  %v3624_v37 = vld [vmem:[%s4783_s2 + $0x4] sm:$0xf0]  ;;  %v3623_v21 = vld [vmem:[%s4783_s2 + $0x4] sm:$0xf] }
 0x67c   : > { %2579 = vadd.xlane.f32.xlu0 %v2575_v8 }
 0x6e7   : > { %v2578_v60 = vpop.xlane.xlu2 %2577 }
 0x6e8   : > { %v2588_v41 = vmul.f32 %v5480_v57, %v2578_v60  ;;  %v3645_v60 = vld [vmem:[%s4786_s4 + $0x30] sm:$0xff] }
 0x6e9   : > { %2906 = vmatpush.bf16.msrb.mxu0 %v3645_v60 }
 0x6ea   : > { %v5483_v15 = vsub.f32 %v2573_v35, %v2588_v41  ;;  %v3456_v35 = vld [vmem:[%s4783_s2] sm:$0xf]  ;;  %v3653_v41 = vld [vmem:[%s4786_s4 + $0x70] sm:$0xff] }
 0x6eb   : > { %v3457_v24 = vor.u32 %v3624_v37, %v3456_v35  ;;  %2920 = vmatpush.bf16.msra.mxu1 %v3653_v41 }
 0x6ec   : > { %v2592_v10 = vmul.f32 %v5483_v15, %v5483_v15 }
 0x6ed   : > { %2779 = vmatpush.bf16.msrb.mxu2 %v3457_v24 }
 0x6ee   : > { %2594 = vadd.xlane.f32.xlu1 %v2592_v10 }
 0x6ef   : > { %v2580_v26 = vpop.xlane.xlu0 %2579  ;;  %2921 = vmatpush.bf16.msra.mxu1 %v3652_v20 }
 0x6f0   : > { %v2589_v2 = vmul.f32 %v5480_v57, %v2580_v26 }
 0x6f2   : > { %v5488_v3 = vsub.f32 %v2575_v8, %v2589_v2  ;;  %v3458_v8 = vld [vmem:[%s4783_s2 + $0x8] sm:$0xf0] }
 0x6f3   : > { %v3461_v16 = vor.u32 %v3623_v21, %v3458_v8  ;;  %2922 = vmatpush.bf16.msra.mxu1 %v3651_v0  ;;  %v3908_v21 = vld [vmem:[%s870_s30] ss:$0 sm:$0xff]  ;;  %s5737_s30 = sld [smem:[#allocation34_spill]] }
 0x6f4   : > { %v2593_v59 = vmul.f32 %v5488_v3, %v5488_v3 }
 0x6f5   : > { %2793 = vmatpush.bf16.msra.mxu3 %v3461_v16 }
 0x6f6   : > { %2596 = vadd.xlane.f32.xlu2 %v2593_v59  ;;  %v3644_v59 = vld [vmem:[%s4786_s4 + $0x28] sm:$0xff] }
 0x6f7   : > { %2907 = vmatpush.bf16.msrb.mxu0 %v3644_v59  ;;  %2923 = vmatpush.bf16.msra.mxu1 %v3650_v11 }
 0x6f9   : > { %s3655_s25 = sshll.u32 %s5737_s30, 4 }
 0x6fa   : > { %s2999_s16 = scalar_lea.hbm %s5740_s19, %s3655_s25 }
 0x6fb   : > { %2908 = vmatpush.bf16.msrb.mxu0 %v3643_v22  ;;  %s3002_s8 = sshll.u32 %s2999_s16, 4  ;;  %s3003_s8 = int_to_ptr.hbm [resolvable:$true] %s3002_s8 }
 0x6fc   : > { %s4269_s9 = sshra.s32 %s3003_s8, 4  ;;  %s4270_s9 = int_to_ptr.hbm [resolvable:$true] %s4269_s9 }
 0x6fd   : > { %s4271_s22 = scalar_lea.hbm %s4270_s9, 16  ;;  %p4276_p7 = scmp.lt.s32.totalorder %s4270_s9, %s5741_s0 }
 0x6fe   : > { %p4272_p6 = scmp.ne.s32.totalorder %s4270_s9, %s4271_s22  ;;  %p4277_p11 = scmp.lt.s32.totalorder %s4275_s10, %s4271_s22 }
 0x6ff   : > { %2909 = vmatpush.bf16.msrb.mxu0 %v3642_v45 }
 0x700   : > { %p4273_p13 = pnand %p4272_p6, %p4678_p8  ;;  %p4278_p12 = por %p4277_p11, %p4276_p7 }
 0x702   : > { %p4274_p3 = pneg %p4273_p13 }
 0x703   : > { %2910 = vmatpush.bf16.msrb.mxu0 %v3641_v47 }
 0x704   : > { %p4279_p0 = pnand %p4278_p12, %p4274_p3 }
 0x707   : > { %2911 = vmatpush.bf16.msrb.mxu0 %v3640_v48 }
 0x70b   : > { %2912 = vmatpush.bf16.msrb.mxu0 %v3639_v40 }
 0x761   : > { %v2595_v33 = vpop.xlane.xlu1 %2594 }
 0x762   : > { %v2598_v58 = vmul.f32 %v2595_v33, %v5480_v57  ;;  %v2688_v33 = vperm.slane %v2650_v25, 0 }
 0x764   : > { %v2600_v12 = vadd.f32 1e-06, %v2598_v58 }
 0x766   : > { %3945 = vrsqrt.f32 %v2600_v12  ;;  %vm2608_vm0 = vweird.f32 %v2600_v12 }
 0x769   : > { %v2597_v55 = vpop.xlane.xlu2 %2596 }
 0x76a   : > { %v2599_v19 = vmul.f32 %v2597_v55, %v5480_v57 }
 0x76c   : > { %v3946_v10 = vpop.eup %3945  ;;  %v2601_v26 = vadd.f32 1e-06, %v2599_v19 }
 0x76d   : > { %v2603_v2 = vmul.f32 %v3946_v10, %v2600_v12  ;;  %vm2609_vm15 = vweird.f32 %v3946_v10 }
 0x76e   : > { %3947 = vrsqrt.f32 %v2601_v26  ;;  %vm2610_vm1 = vmor %vm2608_vm0, %vm2609_vm15  ;;  %vm2618_vm3 = vweird.f32 %v2601_v26 }
 0x76f   : > { %v2604_v53 = vmul.f32 %v3946_v10, %v2603_v2 }
 0x771   : > { %v2605_v51 = vmul.f32 0.5, %v2604_v53 }
 0x773   : > { %v2606_v4 = vsub.f32 1.5, %v2605_v51 }
 0x774   : > { %v3948_v5 = vpop.eup %3947 }
 0x775   : > { %v2607_v13 = vmul.f32 %v3946_v10, %v2606_v4  ;;  %v2613_v9 = vmul.f32 %v3948_v5, %v2601_v26  ;;  %vm2619_vm2 = vweird.f32 %v3948_v5 }
 0x776   : > { %vm2620_vm4 = vmor %vm2618_vm3, %vm2619_vm2 }
 0x777   : > { %v2614_v1 = vmul.f32 %v3948_v5, %v2613_v9  ;;  %v2611_v30 = vsel %vm2610_vm1, %v3946_v10, %v2607_v13 }
 0x778   : > { %v2622_v46 = vmul.f32 %v2611_v30, %v5483_v15 }
 0x779   : > { %v2615_v28 = vmul.f32 0.5, %v2614_v1 }
 0x77a   : > { %v2627_v38 = vmul.f32 %v3906_v18, %v2622_v46 }
 0x77b   : > { %v2616_v17 = vsub.f32 1.5, %v2615_v28 }
 0x77c   : > { %v2632_v29 = vadd.f32 %v3907_v34, %v2627_v38 }
 0x77d   : > { %v2617_v31 = vmul.f32 %v3948_v5, %v2616_v17 }
 0x77f   : > { %v2621_v36 = vsel %vm2620_vm4, %v3948_v5, %v2617_v31 }
 0x780   : > { %v2623_v23 = vmul.f32 %v2621_v36, %v5488_v3  ;;  %v3649_v3 = vld [vmem:[%s4786_s4 + $0x50] sm:$0xff] }
 0x781   : > { %2924 = vmatpush.bf16.msra.mxu1 %v3649_v3 }
 0x782   : > { %v2628_v15 = vmul.f32 %v3906_v18, %v2623_v23 }
 0x784   : > { %v2633_v44 = vadd.f32 %v3907_v34, %v2628_v15  ;;  %v3909_v34 = vld [vmem:[%s873_s11] ss:$0 sm:$0xff] }
 0x785   : > { %2925 = vmatpush.bf16.msra.mxu1 %v3648_v50 }
 0x786   : > { %v2686_v63 = vpack.c.bf16 %v2633_v44, %v2632_v29 }
 0x788   : > { %2780 = vmatmul.bf16.vlgmr.msrb.gmra.mxu2 %v2686_v63  ;;  %2794 = vmatmul.bf16.vlgmr.msra.gmra.mxu3 %v2686_v63 }
 0x789   : > { %2926 = vmatpush.bf16.msra.mxu1 %v3647_v42 }
 0x80b   : > { %v2781_v14 = vpop.f32.mrf.mxu2  ;;  %v2795_v54 = vpop.f32.mrf.mxu3 }
 0x80c   : > { %v2782_v27 = vadd.f32 %v2781_v14, %v2688_v33  ;;  %v2796_v56 = vadd.f32 %v2795_v54, %v2689_v7 }
 0x80e   : > { %v2800_v49 = vmax.f32 %v2782_v27, 0.0  ;;  %v2801_v12 = vmax.f32 %v2796_v56, 0.0 }
 0x813   : > { %v2783_v61 = vpop.f32.mrf.mxu2  ;;  %v2797_v58 = vpop.f32.mrf.mxu3 }
 0x814   : > { %v2784_v43 = vadd.f32 %v2783_v61, %v2688_v33  ;;  %v2798_v62 = vadd.f32 %v2797_v58, %v2689_v7 }
 0x816   : > { %v2802_v32 = vmax.f32 %v2784_v43, 0.0  ;;  %v2803_v6 = vmax.f32 %v2798_v62, 0.0 }
 0x818   : > { %v2804_v35 = vpack.c.bf16 %v2802_v32, %v2800_v49  ;;  %v2805_v37 = vpack.c.bf16 %v2803_v6, %v2801_v12 }
 0x81a   : > { %2913 = vmatmul.bf16.vlgmr.msrb.gmra.mxu0 %v2804_v35  ;;  %2927 = vmatmul.bf16.vlgmr.msra.gmra.mxu1 %v2805_v37 }
 0x897   : > { %v2914_v8 = vpop.f32.mrf.mxu0  ;;  %v2928_v24 = vpop.f32.mrf.mxu1 }
 0x898   : > { %v2915_v52 = vadd.f32 %v3908_v21, %v2914_v8 }
 0x89a   : > { %v2929_v39 = vadd.f32 %v2928_v24, %v2915_v52 }
 0x89c   : > { %v2933_v55 = vadd.f32 %v2929_v39, %v2632_v29 }
 0x89e   : > { %2935 = vadd.xlane.f32.xlu0 %v2933_v55 }
 0x89f   : > { %v2916_v16 = vpop.f32.mrf.mxu0  ;;  %v2930_v60 = vpop.f32.mrf.mxu1 }
 0x8a0   : > { %v2917_v19 = vadd.f32 %v3908_v21, %v2916_v16 }
 0x8a2   : > { %v2931_v41 = vadd.f32 %v2930_v60, %v2917_v19 }
 0x8a4   : > { %v2934_v10 = vadd.f32 %v2931_v41, %v2633_v44  ;;  %v3910_v44 = vld [vmem:[%s876_s26] ss:$0 sm:$0xff]  ;;  %s3000_s26 = sshll.u32 %s4820_s6, 4  ;;  %s3001_s26 = int_to_ptr.vmem [resolvable:$true] %s3000_s26 }
 0x8a6   : > { %2937 = vadd.xlane.f32.xlu1 %v2934_v10 }
 0x911   : > { %v2936_v26 = vpop.xlane.xlu0 %2935 }
 0x912   : > { %v2939_v2 = vmul.f32 %v2936_v26, %v5480_v57 }
 0x914   : > { %v2941_v59 = vsub.f32 %v2933_v55, %v2939_v2 }
 0x916   : > { %v2943_v20 = vmul.f32 %v2941_v59, %v2941_v59 }
 0x918   : > { %2945 = vadd.xlane.f32.xlu2 %v2943_v20 }
 0x919   : > { %v2938_v53 = vpop.xlane.xlu1 %2937 }
 0x91a   : > { %v2940_v51 = vmul.f32 %v2938_v53, %v5480_v57 }
 0x91c   : > { %v2942_v22 = vsub.f32 %v2934_v10, %v2940_v51 }
 0x91e   : > { %v2944_v0 = vmul.f32 %v2942_v22, %v2942_v22 }
 0x920   : > { %2947 = vadd.xlane.f32.xlu0 %v2944_v0 }
 0x98b   : > { %v2946_v4 = vpop.xlane.xlu2 %2945 }
 0x98c   : > { %v2949_v5 = vmul.f32 %v2946_v4, %v5480_v57 }
 0x98e   : > { %v2951_v13 = vadd.f32 1e-06, %v2949_v5 }
 0x990   : > { %3949 = vrsqrt.f32 %v2951_v13  ;;  %vm2959_vm6 = vweird.f32 %v2951_v13 }
 0x993   : > { %v2948_v9 = vpop.xlane.xlu0 %2947 }
 0x994   : > { %v2950_v1 = vmul.f32 %v2948_v9, %v5480_v57 }
 0x996   : > { %v3950_v30 = vpop.eup %3949  ;;  %v2952_v28 = vadd.f32 1e-06, %v2950_v1 }
 0x997   : > { %v2954_v17 = vmul.f32 %v3950_v30, %v2951_v13  ;;  %vm2960_vm5 = vweird.f32 %v3950_v30 }
 0x998   : > { %3951 = vrsqrt.f32 %v2952_v28  ;;  %vm2961_vm7 = vmor %vm2959_vm6, %vm2960_vm5  ;;  %vm2969_vm9 = vweird.f32 %v2952_v28 }
 0x999   : > { %v2955_v46 = vmul.f32 %v3950_v30, %v2954_v17 }
 0x99b   : > { %v2956_v18 = vmul.f32 0.5, %v2955_v46 }
 0x99d   : > { %v2957_v31 = vsub.f32 1.5, %v2956_v18 }
 0x99e   : > { %v3952_v36 = vpop.eup %3951 }
 0x99f   : > { %v2958_v23 = vmul.f32 %v3950_v30, %v2957_v31  ;;  %v2964_v38 = vmul.f32 %v3952_v36, %v2952_v28  ;;  %vm2970_vm8 = vweird.f32 %v3952_v36 }
 0x9a0   : > { %vm2971_vm10 = vmor %vm2969_vm9, %vm2970_vm8 }
 0x9a1   : > { %v2962_v57 = vsel %vm2961_vm7, %v3950_v30, %v2958_v23  ;;  %v2965_v15 = vmul.f32 %v3952_v36, %v2964_v38 }
 0x9a2   : > { %v2973_v29 = vmul.f32 %v2962_v57, %v2941_v59 }
 0x9a3   : > { %v2966_v63 = vmul.f32 0.5, %v2965_v15 }
 0x9a4   : > { %v2978_v45 = vmul.f32 %v3909_v34, %v2973_v29 }
 0x9a5   : > { %v2967_v11 = vsub.f32 1.5, %v2966_v63 }
 0x9a6   : > { %v2983_v47 = vadd.f32 %v3910_v44, %v2978_v45 }
 0x9a7   : > { %v2968_v3 = vmul.f32 %v3952_v36, %v2967_v11 }
 0x9a8   : > { %2985 = vst [vmem:[%s4820_s6] sm:$0xff] %v2983_v47 }
 0x9a9   : > { %v2972_v48 = vsel %vm2971_vm10, %v3952_v36, %v2968_v3 }
 0x9aa   : > { %v2974_v50 = vmul.f32 %v2972_v48, %v2942_v22 }
 0x9ac   : > { %v2979_v40 = vmul.f32 %v3909_v34, %v2974_v50 }
 0x9ae   : > { %v2984_v42 = vadd.f32 %v3910_v44, %v2979_v40 }
 0x9b0   : > { %2986 = vst [vmem:[%s4820_s6 + $0x8] sm:$0xff] %v2984_v42 }
 0x9b1   : > { %4282 = shalt.err (!%p4279_p0)
}
 0x9b2   : > { %s4420_s17 = smov 128   ;;  %s4421_s6 = smov 8  }
 0x9b3   : > { %3685 = dma.vmem_to_hbm [thread:$0]  (%p4678_p8), %s3001_s26, 256, %s3003_s8, %s2988_s14, %s4420_s17, %s4420_s17, %s4421_s6  }
 0x9b4 PF: > { %s5742_s29 = sld [smem:[#allocation30_spill]]  ;;  %p3730_p10 = scmp.ge.s32.totalorder %s4401_s28, 2 }
 0x9b6   : > { %p3720_p2 = pnand %p3730_p10, %p4682_p9 }
 0x9b8   : > { %p3721_p4 = pneg %p3720_p2 }
 0x9ba   : > { %s3017_s2 = sand.u32 1, %s5742_s29  }
 0x9bb   : > { %s3018_s4 = scalar_lea.sflag [#allocation4], %s3017_s2 }
 0x9bc   : > { %4356 = dma.done.wait (%p3721_p4), %s3018_s4, 256  }
 0x9bd   : > { %4358 = vsyncadd (%p3721_p4), %s3018_s4, 4294967040  ;;  %s44_s28 = sadd.s32 1, %s4401_s28   ;;  %s5744_s18 = sld [smem:[#allocation28_spill]] }
 0x9be   : > { %p41_p1 = scmp.ge.s32.totalorder %s44_s28, 6   ;;  %s5745_s19 = sld [smem:[#allocation29_spill]] }
 0x9bf   : > { %s5746_s20 = sld [smem:[#allocation40_spill]] }
 0x9c0   : > { %s5747_s21 = sld [smem:[#allocation31_spill]] }
 0x9c1   : > { %s5748_s22 = sld [smem:[#allocation32_spill]] }
 0x9c2   : > { %s5749_s23 = sld [smem:[#allocation43_spill]]  ;;  %43 = sbr.rel (!%p41_p1) target bundleno = 35 (0x23), region = 230 }
 0x9c3   : > { %s5750_s24 = sld [smem:[#allocation35_spill]] }
 0x9c4   : > { %s5751_s25 = sld [smem:[#allocation36_spill]] }
 0x9c5   : > { %s5752_s26 = sld [smem:[#allocation39_spill]] }
 0x9c6   : > { %s5753_s27 = sld [smem:[#allocation41_spill]] }
 0x9c7   :  { %3024 = vsyncpa [#allocation3], 1 }
 0x9c8   :  { %3026 = vsyncpa [#allocation3 + $0x1], 1 }
 0x9c9   :  { %3027 = vsyncpa [#allocation6], 1 }
 0x9ca   :  { %3029 = vsyncpa [#allocation6 + $0x1], 1 }
 0x9cb   :  { %3030 = vsyncpa [#allocation9], 1 }
 0x9cc   :  { %3031 = vsyncpa [#allocation12], 1 }
 0x9cd   :  { %3033 = vsyncpa [#allocation12 + $0x1], 1 }
 0x9ce   :  { %3034 = vsyncpa [#allocation15], 1 }
 0x9cf   :  { %3036 = vsyncpa [#allocation15 + $0x1], 1 }
 0x9d0   :  { %3037 = vsyncpa [#allocation18], 1 }
 0x9d1   :  { %3039 = vsyncpa [#allocation18 + $0x1], 1 }
 0x9d2   :  { %3040 = vsyncpa [#allocation4], 1 }
 0x9d3   :  { %3042 = vsyncpa [#allocation4 + $0x1], 1 }

</bundles_post_ra>
